<compile_context>
chip_gen: v7x
topology: tpu7x:2x2x1
jax: 0.10.0
libtpu: 0.0.40
codegen_flags: <defaults>
</compile_context>

<pallas_src>
import functools

import jax
import jax.numpy as jnp
from jax.experimental import pallas as pl
from jax.experimental.pallas import tpu as pltpu

BATCH = 2
SEQ = 16
FEATURES = 4
GATE_HIDDEN = 32          # AdvancedGatingNetwork hidden_size (ctor arg, kept small)
FUSION_HIDDEN = 64        # ExpertFusionLayer hidden_size (default)
NUM_EXPERTS = 2
TASK_OUTPUT_LEN = {0: 90, 1: 365}

_VMEM = pltpu.MemorySpace.VMEM


def _round_up(n, m):
    return ((n + m - 1) // m) * m


def _num_heads(L):
    return 4 if L % 4 == 0 else 2 if L % 2 == 0 else 1


# ---------------------------------------------------------------------------
# Static slab layouts (row offsets) — shared by pack_params and the kernel.
# Every block starts on a multiple of 8 sublanes and at lane 0.
# ---------------------------------------------------------------------------
def _make_layouts(task_id):
    F, S = FEATURES, SEQ
    C, Q, HD = GATE_HIDDEN // 2, GATE_HIDDEN // 4, GATE_HIDDEN
    FH = FUSION_HIDDEN
    L = TASK_OUTPUT_LEN[task_id]
    Lp = _round_up(L, 128)
    H = _num_heads(L)

    def build(entries):
        layout, off = {}, 0
        for name, rows, cols in entries:
            layout[name] = (off, rows, cols)
            off += _round_up(rows, 8)
        return layout, off

    g_entries = [
        ('st_w1', 6 * F, C + Q), ('st_b1', 1, C + Q),      # block-diag stat|trend L1
        ('st_w2', C + Q, 2 * Q), ('st_b2', 1, 2 * Q),      # block-diag stat|trend L2
        ('pdst', S * 3 * C + 2 * Q, HD), ('db1', 1, HD),   # conv-pool + stat/trend rows of dw1
        ('dw2', HD, C), ('db2', 1, C),
        ('dw3', C, NUM_EXPERTS), ('db3', 1, NUM_EXPERTS),
    ]
    g_layout, g_rows = build(g_entries)

    w_entries = [('ow', Lp, Lp), ('fw1', 2 * Lp, FH), ('fw2', FH, Lp)]
    if H > 1:
        w_entries.append(('hms', Lp, H))                   # lane -> head one-hot (bf16)
    w_layout, w_rows = build(w_entries)

    b_entries = [('wlt', 2 * F, Lp), ('blt', 2, Lp), ('inb', 3, Lp),
                 ('ob', 1, Lp), ('fb1', 1, FH), ('fb2', 1, Lp)]
    if H > 1:
        b_entries.append(('hmt', H, Lp))                   # head -> lane one-hot (f32, K tiny)
    b_layout, b_rows = build(b_entries)

    return dict(L=L, Lp=Lp, H=H, hd=L // H, FH=FH,
                g_layout=g_layout, g_rows=g_rows,
                w_layout=w_layout, w_rows=w_rows,
                b_layout=b_layout, b_rows=b_rows)


# ---------------------------------------------------------------------------
# Fused MoEV2 kernel: gating + experts + fusion in one invocation, no grid.
# ---------------------------------------------------------------------------
def _moe_fused_kernel(cfg, xflat_ref, x_ref, convw_ref, g_ref, inw_ref, w_ref,
                      b_ref, out_ref, gate_ref):
    f32, bf16 = jnp.float32, jnp.bfloat16
    B, S = cfg['B'], cfg['S']
    Lp, H, hd = cfg['Lp'], cfg['H'], cfg['hd']
    g_lay, w_lay, b_lay = cfg['g_layout'], cfg['w_layout'], cfg['b_layout']

    def blk(ref, layout, name):
        r0, nr, nc = layout[name]
        return ref[r0:r0 + nr, 0:nc]          # static, 8/128-aligned slice: free

    gslab = lambda n: blk(g_ref, g_lay, n)
    wslab = lambda n: blk(w_ref, w_lay, n)
    bslab = lambda n: blk(b_ref, b_lay, n)

    x = x_ref[...]                                               # [B, S, F] f32

    # ---------------- AdvancedGatingNetwork ----------------
    # All three Conv1d branches + ReLU as ONE matmul against the pack-time
    # im2col weight matrix; the mean-over-seq is folded into the first
    # decision-network layer (pdst), so per-position conv never leaves vregs.
    SF = S * FEATURES
    conv = jnp.dot(xflat_ref[...], convw_ref[0:SF, :],
                   preferred_element_type=f32) + convw_ref[SF:SF + 1, :]  # [B, S*3C]
    conv = jnp.maximum(conv, 0.0)

    # sequence statistics (torch.std is unbiased) + trend features
    x_mean = jnp.mean(x, axis=1)                                 # [B, F]
    xc = x - x_mean[:, None, :]
    x_std = jnp.sqrt(jnp.sum(xc * xc, axis=1) * (1.0 / (S - 1)))
    x_min = jnp.min(x, axis=1)
    x_max = jnp.max(x, axis=1)
    if S >= 7:
        last, m7 = x[:, S - 1, :], x[:, S - 7, :]
        slope = (last - m7) * (1.0 / 7.0)
        if S >= 14:
            accel = (last - 2.0 * m7 + x[:, S - 14, :]) * (1.0 / 49.0)
        else:
            accel = jnp.zeros_like(slope)
    else:
        slope = jnp.zeros_like(x_mean)
        accel = jnp.zeros_like(x_mean)

    # stat + trend analyzers fused via block-diagonal weights (2 matmuls)
    st_in = jnp.concatenate([x_mean, x_std, x_min, x_max, slope, accel], axis=1)
    st_h = jnp.maximum(jnp.dot(st_in, gslab('st_w1'),
                               preferred_element_type=f32) + gslab('st_b1'), 0.0)
    st_f = jnp.maximum(jnp.dot(st_h, gslab('st_w2'),
                               preferred_element_type=f32) + gslab('st_b2'), 0.0)

    # decision network: conv pooling + task embedding folded into layer 1
    dfeat = jnp.concatenate([conv, st_f], axis=1)                # [B, S*3C + 2Q]
    d1 = jnp.maximum(jnp.dot(dfeat, gslab('pdst'),
                             preferred_element_type=f32) + gslab('db1'), 0.0)
    d2 = jnp.maximum(jnp.dot(d1, gslab('dw2'),
                             preferred_element_type=f32) + gslab('db2'), 0.0)
    logits = (jnp.dot(d2, gslab('dw3'), preferred_element_type=f32)
              + gslab('db3')) * cfg['inv_temp']                  # lbias folded into db3
    lmax = jnp.max(logits, axis=-1, keepdims=True)
    e = jnp.exp(logits - lmax)
    gate = e / jnp.sum(e, axis=-1, keepdims=True)                # exact: sums to 1
    gate_ref[...] = gate

    # ---------------- experts (placeholders, see TODO at top) --------------
    # both expert heads in ONE matmul: block-diag(pooled) @ [wl; wt] (K=4 -> f32)
    zero = jnp.zeros_like(x_mean)
    pooled_blk = jnp.concatenate(
        [jnp.concatenate([x_mean, zero], axis=1),
         jnp.concatenate([zero, x_mean], axis=1)], axis=0)       # [2B, 2F]
    eo_lin = jnp.dot(pooled_blk, bslab('wlt'), preferred_element_type=f32)  # [2B, Lp]
    blt = bslab('blt')
    bias_lt = jnp.concatenate([blt[0:1]] * B + [blt[1:2]] * B, axis=0)
    eo = jnp.tanh(eo_lin + bias_lt)                              # expert-major [2B, Lp]
    lstm_out, tr_out = eo[0:B], eo[B:]
    # lanes >= L are exactly 0 by construction of the zero-padded weights.

    # ---------------- ExpertFusionLayer ----------------
    weighted = gate[:, 0:1] * lstm_out + gate[:, 1:2] * tr_out   # [B, Lp]

    # QKV for all B*E expert tokens in one bf16 matmul (K = Lp, lane-aligned)
    inb = bslab('inb')
    qkv = jnp.dot(eo.astype(bf16), inw_ref[...], preferred_element_type=f32)
    q = qkv[:, 0:Lp] + inb[0:1]
    k = qkv[:, Lp:2 * Lp] + inb[1:2]
    v = qkv[:, 2 * Lp:3 * Lp] + inb[2:3]
    q0, q1 = q[0:B], q[B:]
    k0, k1 = k[0:B], k[B:]
    v0, v1 = v[0:B], v[B:]

    # all four per-head score vectors from ONE reduction
    qk = jnp.concatenate([q0 * k0, q0 * k1, q1 * k0, q1 * k1], axis=0)   # [4B, Lp]
    inv_sqrt_hd = 1.0 / float(hd) ** 0.5
    if H == 1:
        s = jnp.sum(qk, axis=-1, keepdims=True) * inv_sqrt_hd            # [4B, 1], XLU
    else:
        s = jnp.dot(qk.astype(bf16), wslab('hms'),
                    preferred_element_type=f32) * inv_sqrt_hd            # [4B, H]

    def softmax2(pair):                          # pair [2B, H]: key0 rows then key1 rows
        a, b = pair[0:B], pair[B:]
        m = jnp.maximum(a, b)
        ea, eb = jnp.exp(a - m), jnp.exp(b - m)
        inv = pl.reciprocal(ea + eb, approx=True)                        # EUP slot
        return ea * inv, eb * inv

    p00, p01 = softmax2(s[0:2 * B])              # queries from expert 0
    p10, p11 = softmax2(s[2 * B:])               # queries from expert 1

    if H == 1:
        ctx0 = p00 * v0 + p01 * v1               # scalar lane-broadcast, no MXU needed
        ctx1 = p10 * v0 + p11 * v1
    else:
        p_stack = jnp.concatenate([p00, p01, p10, p11], axis=0)          # [4B, H] f32
        pe = jnp.dot(p_stack, bslab('hmt'), preferred_element_type=f32)  # ONE expansion matmul
        ctx0 = pe[0:B] * v0 + pe[B:2 * B] * v1
        ctx1 = pe[2 * B:3 * B] * v0 + pe[3 * B:] * v1

    # mean over the 2 expert tokens commutes with the linear out-projection
    ctx_mean = 0.5 * (ctx0 + ctx1)
    attended = jnp.dot(ctx_mean.astype(bf16), wslab('ow'),
                       preferred_element_type=f32) + bslab('ob')         # [B, Lp]

    # transform(cat([weighted, attended])); residual weight folded into fw2/fb2
    t_in = jnp.concatenate([weighted, attended], axis=1).astype(bf16)    # [B, 2Lp]
    t1 = jnp.maximum(jnp.dot(t_in, wslab('fw1'),
                             preferred_element_type=f32) + bslab('fb1'), 0.0)
    t2 = jnp.dot(t1.astype(bf16), wslab('fw2'),
                 preferred_element_type=f32) + bslab('fb2')              # rw pre-folded
    out_ref[...] = weighted + t2


# ---------------------------------------------------------------------------
# Parameter init (torch-like layouts)
# ---------------------------------------------------------------------------
def init_params(key, task_id=0):
    F, H = FEATURES, GATE_HIDDEN
    C, Q = H // 2, H // 4
    L = TASK_OUTPUT_LEN[task_id]
    FH = FUSION_HIDDEN
    keys = iter(jax.random.split(key, 32))

    def w(shape, scale=0.2):
        return scale * jax.random.normal(next(keys), shape, dtype=jnp.float32)

    def z(shape):
        return jnp.zeros(shape, dtype=jnp.float32)

    gating = dict(
        cw3=w((3, F, C)), cb3=z((C,)),
        cw7=w((7, F, C)), cb7=z((C,)),
        cw15=w((15, F, C)), cb15=z((C,)),
        temb=w((2, Q), 1.0),
        sw1=w((4 * F, C)), sb1=z((C,)),
        sw2=w((C, Q)), sb2=z((Q,)),
        tw1=w((2 * F, Q)), tb1=z((Q,)),
        tw2=w((Q, Q)), tb2=z((Q,)),
        dw1=w((3 * C + 3 * Q, H)), db1=z((H,)),
        dw2=w((H, C)), db2=z((C,)),
        dw3=w((C, NUM_EXPERTS)), db3=z((NUM_EXPERTS,)),
    )
    experts = dict(wl=w((F, L)), bl=z((L,)), wt=w((F, L)), bt=z((L,)))
    fusion = dict(
        inw=w((L, 3 * L), 0.05), inb=z((3 * L,)),
        ow=w((L, L), 0.05), ob=z((L,)),
        fw1=w((2 * L, FH), 0.05), fb1=z((FH,)),
        fw2=w((FH, L), 0.05), fb2=z((L,)),
        rw=jnp.array(0.1, dtype=jnp.float32),
    )
    return dict(gating=gating, experts=experts, fusion=fusion)


def _conv_im2col_matrix(branches, S, F):
    """Fold all Conv1d branches into one [S*F, S*3C] im2col weight matrix."""
    cols = []
    for w, pad in branches:                       # w: [K, F, C]
        K = w.shape[0]
        t = jnp.arange(S)[:, None, None]
        kk = jnp.arange(K)[None, :, None]
        s = jnp.arange(S)[None, None, :]
        G = (s == t + kk - pad).astype(jnp.float32)          # [S(t), K, S(s)]
        cols.append(jnp.einsum('tks,kfc->sftc', G, w))       # [S, F, S, C]
    M = jnp.concatenate(cols, axis=-1)                        # [S, F, S, 3C]
    return M.reshape(S * F, -1)


# ---------------------------------------------------------------------------
# One-time packing: fold constants, merge weights, build the VMEM slabs.
# ---------------------------------------------------------------------------
def pack_params(params, task_id):
    lay = _make_layouts(task_id)
    gp, ep, fp = params['gating'], params['experts'], params['fusion']
    F, S = FEATURES, SEQ
    C, Q = GATE_HIDDEN // 2, GATE_HIDDEN // 4
    L, Lp, H, hd, FH = lay['L'], lay['Lp'], lay['H'], lay['hd'], lay['FH']

    def pad_lanes(a, width):
        return jnp.pad(a, [(0, 0)] * (a.ndim - 1) + [(0, width - a.shape[-1])])

    def pad2(a, rr, cc):
        return jnp.pad(a, ((0, rr - a.shape[0]), (0, cc - a.shape[1])))

    def fill(layout, nrows, width, blocks, dtype):
        slab = jnp.zeros((nrows, width), dtype=jnp.float32)
        for name, arr in blocks.items():
            off, r, c = layout[name]
            slab = slab.at[off:off + r, 0:c].set(jnp.asarray(arr, jnp.float32))
        return slab.astype(dtype)

    # --- conv branches folded into a single im2col weight matrix + bias row ---
    M = _conv_im2col_matrix(
        [(gp['cw3'], 1), (gp['cw7'], 3), (gp['cw15'], 7)], S, F)     # [S*F, S*3C]
    bconv = jnp.tile(jnp.concatenate([gp['cb3'], gp['cb7'], gp['cb15']]), S)
    convw = jnp.zeros((_round_up(S * F + 1, 8), S * 3 * C), jnp.float32)
    convw = convw.at[0:S * F, :].set(M).at[S * F, :].set(bconv)

    # --- gating slab: block-diag stat/trend, pooling / temb / lbias folded ---
    st_w1 = jnp.zeros((6 * F, C + Q), jnp.float32)
    st_w1 = st_w1.at[0:4 * F, 0:C].set(gp['sw1']).at[4 * F:, C:].set(gp['tw1'])
    st_w2 = jnp.zeros((C + Q, 2 * Q), jnp.float32)
    st_w2 = st_w2.at[0:C, 0:Q].set(gp['sw2']).at[C:, Q:].set(gp['tw2'])
    dw1_conv = gp['dw1'][0:3 * C]
    dw1_temb = gp['dw1'][3 * C:3 * C + Q]
    dw1_st = gp['dw1'][3 * C + Q:]
    pdst = jnp.concatenate([jnp.tile(dw1_conv * (1.0 / S), (S, 1)), dw1_st], axis=0)
    db1 = (gp['db1'] + gp['temb'][task_id] @ dw1_temb)[None, :]       # task emb folded
    lbias = jnp.array([0.0, 0.1] if task_id == 0 else [0.1, 0.0], jnp.float32)
    db3 = (gp['db3'] + lbias)[None, :]                                # +0.1 logit bias folded
    slab_g = fill(lay['g_layout'], lay['g_rows'], 128, dict(
        st_w1=st_w1, st_b1=jnp.concatenate([gp['sb1'], gp['tb1']])[None, :],
        st_w2=st_w2, st_b2=jnp.concatenate([gp['sb2'], gp['tb2']])[None, :],
        pdst=pdst, db1=db1, dw2=gp['dw2'], db2=gp['db2'][None, :],
        dw3=gp['dw3'], db3=db3), jnp.float32)

    # --- f32 slab: expert heads (K=4 -> keep f32), biases, head->lane mask ---
    rw = fp['rw']
    b_blocks = dict(
        wlt=pad_lanes(jnp.concatenate([ep['wl'], ep['wt']], axis=0), Lp),
        blt=pad_lanes(jnp.stack([ep['bl'], ep['bt']], axis=0), Lp),
        inb=pad_lanes(fp['inb'].reshape(3, L), Lp),
        ob=pad_lanes(fp['ob'][None, :], Lp),
        fb1=fp['fb1'][None, :],
        fb2=pad_lanes((rw * fp['fb2'])[None, :], Lp),                 # residual weight folded
    )

    # --- bf16 slab: large-K MXU weights (+ lane->head mask) ---
    w_blocks = dict(
        ow=pad2(fp['ow'], Lp, Lp),
        fw1=jnp.concatenate([pad2(fp['fw1'][0:L], Lp, FH),
                             pad2(fp['fw1'][L:], Lp, FH)], axis=0),   # [2Lp, FH]
        fw2=pad_lanes(rw * fp['fw2'], Lp),                            # residual weight folded
    )
    if H > 1:
        lane = jnp.arange(Lp)
        hmask = (((lane[:, None] // hd) == jnp.arange(H)[None, :])
                 & (lane < L)[:, None]).astype(jnp.float32)           # [Lp, H], exact 0/1
        w_blocks['hms'] = hmask
        b_blocks['hmt'] = hmask.T

    slab_w = fill(lay['w_layout'], lay['w_rows'], Lp, w_blocks, jnp.bfloat16)
    slab_b = fill(lay['b_layout'], lay['b_rows'], Lp, b_blocks, jnp.float32)

    # q|k|v blocks padded independently so in-kernel lane slices stay 128-aligned
    inw = jnp.concatenate(
        [pad2(fp['inw'][:, i * L:(i + 1) * L], Lp, Lp) for i in range(3)],
        axis=1).astype(jnp.bfloat16)                                  # [Lp, 3Lp]

    return dict(convw=convw, slab_g=slab_g, inw=inw, slab_w=slab_w, slab_b=slab_b)


# ---------------------------------------------------------------------------
# MoEV2Model forward: one fused pallas_call (single launch, 7 input DMAs)
# ---------------------------------------------------------------------------
@functools.partial(jax.jit, static_argnames=("task_id", "epoch", "max_epochs"))
def moe_v2_forward(x, packed, task_id=0, epoch=0, max_epochs=100):
    # AdvancedGatingNetwork.update_temperature — static, fold 1/T into the kernel
    temperature = max(0.5, 2.0 * (1.0 - epoch / max_epochs))
    inv_temp = 1.0 / temperature
    B, S, F = x.shape
    lay = _make_layouts(task_id)
    L, Lp = lay['L'], lay['Lp']

    xflat = x.reshape(B, S * F)        # free bitcast; conv runs as an in-kernel matmul

    cfg = dict(inv_temp=float(inv_temp), B=B, S=S, Lp=Lp,
               H=lay['H'], hd=lay['hd'],
               g_layout=lay['g_layout'], w_layout=lay['w_layout'],
               b_layout=lay['b_layout'])

    out_pad, gate = pl.pallas_call(
        functools.partial(_moe_fused_kernel, cfg),
        out_shape=(jax.ShapeDtypeStruct((B, Lp), jnp.float32),
                   jax.ShapeDtypeStruct((B, NUM_EXPERTS), jnp.float32)),
        in_specs=[pl.BlockSpec(memory_space=_VMEM)] * 7,
        out_specs=(pl.BlockSpec(memory_space=_VMEM),
                   pl.BlockSpec(memory_space=_VMEM)),
        compiler_params=pltpu.CompilerParams(vmem_limit_bytes=16 * 1024 * 1024),
    )(xflat, x, packed['convw'], packed['slab_g'], packed['inw'],
      packed['slab_w'], packed['slab_b'])
    return out_pad[:, :L], gate


if __name__ == "__main__":
    key = jax.random.PRNGKey(0)
    kx, kp = jax.random.split(key)
    x = jax.random.normal(kx, (BATCH, SEQ, FEATURES), dtype=jnp.float32)
    params = init_params(kp, task_id=0)
    packed = pack_params(params, task_id=0)   # one-time layout prep (not in the hot path)

    output, gate_weights = moe_v2_forward(x, packed, task_id=0, epoch=0, max_epochs=100)
    output = jax.block_until_ready(output)
    gate_weights = jax.block_until_ready(gate_weights)

    assert output.shape == (BATCH, TASK_OUTPUT_LEN[0])
    assert gate_weights.shape == (BATCH, NUM_EXPERTS)
    assert bool(jnp.all(jnp.isfinite(output)))
    assert bool(jnp.allclose(jnp.sum(gate_weights, axis=-1), 1.0, atol=1e-5))
    print("KERNEL_OK")
</pallas_src>

<mosaic_0001>
module attributes {stable_mosaic.version = 11 : i64} {
  func.func @_moe_fused_kernel(%arg0: memref<2x64xf32, #tpu.memory_space<vmem>>, %arg1: memref<2x16x4xf32, #tpu.memory_space<vmem>>, %arg2: memref<72x768xf32, #tpu.memory_space<vmem>>, %arg3: memref<920x128xf32, #tpu.memory_space<vmem>>, %arg4: memref<128x384xbf16, #tpu.memory_space<vmem>>, %arg5: memref<576x128xbf16, #tpu.memory_space<vmem>>, %arg6: memref<56x128xf32, #tpu.memory_space<vmem>>, %arg7: memref<2x128xf32, #tpu.memory_space<vmem>>, %arg8: memref<2x2xf32, #tpu.memory_space<vmem>>) attributes {dimension_semantics = [], scalar_prefetch = 0 : i64, scratch_operands = 0 : i64, tpu.core_type = #tpu.core_type<tc>} {
    %c0 = arith.constant 0 : index
    %c0_0 = arith.constant 0 : index
    %c0_1 = arith.constant 0 : index
    %0 = vector.load %arg1[%c0, %c0_0, %c0_1] : memref<2x16x4xf32, #tpu.memory_space<vmem>>, vector<2x16x4xf32>
    %c0_2 = arith.constant 0 : index
    %c0_3 = arith.constant 0 : index
    %1 = vector.load %arg0[%c0_2, %c0_3] : memref<2x64xf32, #tpu.memory_space<vmem>>, vector<2x64xf32>
    %c0_4 = arith.constant 0 : index
    %c0_5 = arith.constant 0 : index
    %2 = vector.load %arg2[%c0_4, %c0_5] : memref<72x768xf32, #tpu.memory_space<vmem>>, vector<64x768xf32>
    %cst = arith.constant dense<0.000000e+00> : vector<2x768xf32>
    %3 = tpu.matmul %1, %2, %cst {dimension_numbers = #tpu.dot_dimension_numbers<[1], [0], [0], [1], [0, 0, 1, 1], [], []>} : vector<2x64xf32>, vector<64x768xf32>, vector<2x768xf32> -> vector<2x768xf32>
    %c64 = arith.constant 64 : index
    %c0_6 = arith.constant 0 : index
    %4 = vector.load %arg2[%c64, %c0_6] : memref<72x768xf32, #tpu.memory_space<vmem>>, vector<1x768xf32>
    %5 = vector.broadcast %4 : vector<1x768xf32> to vector<2x768xf32>
    %6 = arith.addf %3, %5 : vector<2x768xf32>
    %cst_7 = arith.constant 0.000000e+00 : f32
    %7 = vector.broadcast %cst_7 : f32 to vector<2x768xf32>
    %8 = arith.maximumf %6, %7 : vector<2x768xf32>
    %cst_8 = arith.constant dense<0.000000e+00> : vector<2x4xf32>
    %9 = vector.multi_reduction <add>, %0, %cst_8 [1] : vector<2x16x4xf32> to vector<2x4xf32>
    %cst_9 = arith.constant 1.600000e+01 : f32
    %10 = vector.broadcast %cst_9 : f32 to vector<2x4xf32>
    %11 = arith.divf %9, %10 : vector<2x4xf32>
    %12 = vector.shape_cast %11 : vector<2x4xf32> to vector<2x1x4xf32>
    %13 = vector.broadcast %12 : vector<2x1x4xf32> to vector<2x16x4xf32>
    %14 = arith.subf %0, %13 : vector<2x16x4xf32>
    %15 = arith.mulf %14, %14 : vector<2x16x4xf32>
    %cst_10 = arith.constant dense<0.000000e+00> : vector<2x4xf32>
    %16 = vector.multi_reduction <add>, %15, %cst_10 [1] : vector<2x16x4xf32> to vector<2x4xf32>
    %cst_11 = arith.constant 0.0666666701 : f32
    %17 = vector.broadcast %cst_11 : f32 to vector<2x4xf32>
    %18 = arith.mulf %16, %17 : vector<2x4xf32>
    %19 = math.sqrt %18 : vector<2x4xf32>
    %cst_12 = arith.constant dense<0x7F800000> : vector<2x4xf32>
    %20 = vector.multi_reduction <minimumf>, %0, %cst_12 [1] : vector<2x16x4xf32> to vector<2x4xf32>
    %cst_13 = arith.constant dense<0xFF800000> : vector<2x4xf32>
    %21 = vector.multi_reduction <maximumf>, %0, %cst_13 [1] : vector<2x16x4xf32> to vector<2x4xf32>
    %22 = vector.extract_strided_slice %0 {offsets = [0, 15, 0], sizes = [2, 1, 4], strides = [1, 1, 1]} : vector<2x16x4xf32> to vector<2x1x4xf32>
    %23 = vector.shape_cast %22 : vector<2x1x4xf32> to vector<2x4xf32>
    %24 = vector.extract_strided_slice %0 {offsets = [0, 9, 0], sizes = [2, 1, 4], strides = [1, 1, 1]} : vector<2x16x4xf32> to vector<2x1x4xf32>
    %25 = vector.shape_cast %24 : vector<2x1x4xf32> to vector<2x4xf32>
    %26 = arith.subf %23, %25 : vector<2x4xf32>
    %cst_14 = arith.constant 0.142857149 : f32
    %27 = vector.broadcast %cst_14 : f32 to vector<2x4xf32>
    %28 = arith.mulf %26, %27 : vector<2x4xf32>
    %cst_15 = arith.constant 2.000000e+00 : f32
    %29 = vector.broadcast %cst_15 : f32 to vector<2x4xf32>
    %30 = arith.mulf %29, %25 : vector<2x4xf32>
    %31 = arith.subf %23, %30 : vector<2x4xf32>
    %32 = vector.extract_strided_slice %0 {offsets = [0, 2, 0], sizes = [2, 1, 4], strides = [1, 1, 1]} : vector<2x16x4xf32> to vector<2x1x4xf32>
    %33 = vector.shape_cast %32 : vector<2x1x4xf32> to vector<2x4xf32>
    %34 = arith.addf %31, %33 : vector<2x4xf32>
    %cst_16 = arith.constant 0.0204081628 : f32
    %35 = vector.broadcast %cst_16 : f32 to vector<2x4xf32>
    %36 = arith.mulf %34, %35 : vector<2x4xf32>
    %37 = tpu.concatenate %11, %19, %20, %21, %28, %36 in 1 : vector<2x4xf32>, vector<2x4xf32>, vector<2x4xf32>, vector<2x4xf32>, vector<2x4xf32>, vector<2x4xf32> -> vector<2x24xf32>
    %c0_17 = arith.constant 0 : index
    %c0_18 = arith.constant 0 : index
    %38 = vector.load %arg3[%c0_17, %c0_18] : memref<920x128xf32, #tpu.memory_space<vmem>>, vector<24x24xf32>
    %cst_19 = arith.constant dense<0.000000e+00> : vector<2x24xf32>
    %39 = tpu.matmul %37, %38, %cst_19 {dimension_numbers = #tpu.dot_dimension_numbers<[1], [0], [0], [1], [0, 0, 1, 1], [], []>} : vector<2x24xf32>, vector<24x24xf32>, vector<2x24xf32> -> vector<2x24xf32>
    %c24 = arith.constant 24 : index
    %c0_20 = arith.constant 0 : index
    %40 = vector.load %arg3[%c24, %c0_20] : memref<920x128xf32, #tpu.memory_space<vmem>>, vector<1x24xf32>
    %41 = vector.broadcast %40 : vector<1x24xf32> to vector<2x24xf32>
    %42 = arith.addf %39, %41 : vector<2x24xf32>
    %cst_21 = arith.constant 0.000000e+00 : f32
    %43 = vector.broadcast %cst_21 : f32 to vector<2x24xf32>
    %44 = arith.maximumf %42, %43 : vector<2x24xf32>
    %c32 = arith.constant 32 : index
    %c0_22 = arith.constant 0 : index
    %45 = vector.load %arg3[%c32, %c0_22] : memref<920x128xf32, #tpu.memory_space<vmem>>, vector<24x16xf32>
    %cst_23 = arith.constant dense<0.000000e+00> : vector<2x16xf32>
    %46 = tpu.matmul %44, %45, %cst_23 {dimension_numbers = #tpu.dot_dimension_numbers<[1], [0], [0], [1], [0, 0, 1, 1], [], []>} : vector<2x24xf32>, vector<24x16xf32>, vector<2x16xf32> -> vector<2x16xf32>
    %c56 = arith.constant 56 : index
    %c0_24 = arith.constant 0 : index
    %47 = vector.load %arg3[%c56, %c0_24] : memref<920x128xf32, #tpu.memory_space<vmem>>, vector<1x16xf32>
    %48 = vector.broadcast %47 : vector<1x16xf32> to vector<2x16xf32>
    %49 = arith.addf %46, %48 : vector<2x16xf32>
    %cst_25 = arith.constant 0.000000e+00 : f32
    %50 = vector.broadcast %cst_25 : f32 to vector<2x16xf32>
    %51 = arith.maximumf %49, %50 : vector<2x16xf32>
    %52 = tpu.concatenate %8, %51 in 1 : vector<2x768xf32>, vector<2x16xf32> -> vector<2x784xf32>
    %c64_26 = arith.constant 64 : index
    %c0_27 = arith.constant 0 : index
    %53 = vector.load %arg3[%c64_26, %c0_27] : memref<920x128xf32, #tpu.memory_space<vmem>>, vector<784x32xf32>
    %cst_28 = arith.constant dense<0.000000e+00> : vector<2x32xf32>
    %54 = tpu.matmul %52, %53, %cst_28 {dimension_numbers = #tpu.dot_dimension_numbers<[1], [0], [0], [1], [0, 0, 1, 1], [], []>} : vector<2x784xf32>, vector<784x32xf32>, vector<2x32xf32> -> vector<2x32xf32>
    %c848 = arith.constant 848 : index
    %c0_29 = arith.constant 0 : index
    %55 = vector.load %arg3[%c848, %c0_29] : memref<920x128xf32, #tpu.memory_space<vmem>>, vector<1x32xf32>
    %56 = vector.broadcast %55 : vector<1x32xf32> to vector<2x32xf32>
    %57 = arith.addf %54, %56 : vector<2x32xf32>
    %cst_30 = arith.constant 0.000000e+00 : f32
    %58 = vector.broadcast %cst_30 : f32 to vector<2x32xf32>
    %59 = arith.maximumf %57, %58 : vector<2x32xf32>
    %c856 = arith.constant 856 : index
    %c0_31 = arith.constant 0 : index
    %60 = vector.load %arg3[%c856, %c0_31] : memref<920x128xf32, #tpu.memory_space<vmem>>, vector<32x16xf32>
    %cst_32 = arith.constant dense<0.000000e+00> : vector<2x16xf32>
    %61 = tpu.matmul %59, %60, %cst_32 {dimension_numbers = #tpu.dot_dimension_numbers<[1], [0], [0], [1], [0, 0, 1, 1], [], []>} : vector<2x32xf32>, vector<32x16xf32>, vector<2x16xf32> -> vector<2x16xf32>
    %c888 = arith.constant 888 : index
    %c0_33 = arith.constant 0 : index
    %62 = vector.load %arg3[%c888, %c0_33] : memref<920x128xf32, #tpu.memory_space<vmem>>, vector<1x16xf32>
    %63 = vector.broadcast %62 : vector<1x16xf32> to vector<2x16xf32>
    %64 = arith.addf %61, %63 : vector<2x16xf32>
    %cst_34 = arith.constant 0.000000e+00 : f32
    %65 = vector.broadcast %cst_34 : f32 to vector<2x16xf32>
    %66 = arith.maximumf %64, %65 : vector<2x16xf32>
    %c896 = arith.constant 896 : index
    %c0_35 = arith.constant 0 : index
    %67 = vector.load %arg3[%c896, %c0_35] : memref<920x128xf32, #tpu.memory_space<vmem>>, vector<16x2xf32>
    %cst_36 = arith.constant dense<0.000000e+00> : vector<2x2xf32>
    %68 = tpu.matmul %66, %67, %cst_36 {dimension_numbers = #tpu.dot_dimension_numbers<[1], [0], [0], [1], [0, 0, 1, 1], [], []>} : vector<2x16xf32>, vector<16x2xf32>, vector<2x2xf32> -> vector<2x2xf32>
    %c912 = arith.constant 912 : index
    %c0_37 = arith.constant 0 : index
    %69 = vector.load %arg3[%c912, %c0_37] : memref<920x128xf32, #tpu.memory_space<vmem>>, vector<1x2xf32>
    %70 = vector.broadcast %69 : vector<1x2xf32> to vector<2x2xf32>
    %71 = arith.addf %68, %70 : vector<2x2xf32>
    %cst_38 = arith.constant 5.000000e-01 : f32
    %72 = vector.broadcast %cst_38 : f32 to vector<2x2xf32>
    %73 = arith.mulf %71, %72 : vector<2x2xf32>
    %cst_39 = arith.constant dense<0xFF800000> : vector<2xf32>
    %74 = vector.multi_reduction <maximumf>, %73, %cst_39 [1] : vector<2x2xf32> to vector<2xf32>
    %75 = vector.shape_cast %74 : vector<2xf32> to vector<2x1xf32>
    %76 = vector.broadcast %75 : vector<2x1xf32> to vector<2x2xf32>
    %77 = arith.subf %73, %76 : vector<2x2xf32>
    %78 = math.exp %77 : vector<2x2xf32>
    %cst_40 = arith.constant dense<0.000000e+00> : vector<2xf32>
    %79 = vector.multi_reduction <add>, %78, %cst_40 [1] : vector<2x2xf32> to vector<2xf32>
    %80 = vector.shape_cast %79 : vector<2xf32> to vector<2x1xf32>
    %81 = vector.broadcast %80 : vector<2x1xf32> to vector<2x2xf32>
    %82 = arith.divf %78, %81 : vector<2x2xf32>
    %c0_41 = arith.constant 0 : index
    %c0_42 = arith.constant 0 : index
    %83 = vector.load %arg8[%c0_41, %c0_42] : memref<2x2xf32, #tpu.memory_space<vmem>>, vector<2x2xf32>
    tpu.vector_store %arg8[%c0_41, %c0_42], %82 {strides = array<i32>} : memref<2x2xf32, #tpu.memory_space<vmem>>, vector<2x2xf32>,
    %cst_43 = arith.constant 0.000000e+00 : f32
    %84 = vector.broadcast %cst_43 : f32 to vector<2x4xf32>
    %85 = tpu.concatenate %11, %84 in 1 : vector<2x4xf32>, vector<2x4xf32> -> vector<2x8xf32>
    %86 = tpu.concatenate %84, %11 in 1 : vector<2x4xf32>, vector<2x4xf32> -> vector<2x8xf32>
    %87 = tpu.concatenate %85, %86 in 0 : vector<2x8xf32>, vector<2x8xf32> -> vector<4x8xf32>
    %c0_44 = arith.constant 0 : index
    %c0_45 = arith.constant 0 : index
    %88 = vector.load %arg6[%c0_44, %c0_45] : memref<56x128xf32, #tpu.memory_space<vmem>>, vector<8x128xf32>
    %cst_46 = arith.constant dense<0.000000e+00> : vector<4x128xf32>
    %89 = tpu.matmul %87, %88, %cst_46 {dimension_numbers = #tpu.dot_dimension_numbers<[1], [0], [0], [1], [0, 0, 1, 1], [], []>} : vector<4x8xf32>, vector<8x128xf32>, vector<4x128xf32> -> vector<4x128xf32>
    %c8 = arith.constant 8 : index
    %c0_47 = arith.constant 0 : index
    %90 = vector.load %arg6[%c8, %c0_47] : memref<56x128xf32, #tpu.memory_space<vmem>>, vector<2x128xf32>
    %91 = vector.extract_strided_slice %90 {offsets = [0, 0], sizes = [1, 128], strides = [1, 1]} : vector<2x128xf32> to vector<1x128xf32>
    %92 = vector.extract_strided_slice %90 {offsets = [1, 0], sizes = [1, 128], strides = [1, 1]} : vector<2x128xf32> to vector<1x128xf32>
    %93 = tpu.concatenate %91, %91, %92, %92 in 0 : vector<1x128xf32>, vector<1x128xf32>, vector<1x128xf32>, vector<1x128xf32> -> vector<4x128xf32>
    %94 = arith.addf %89, %93 : vector<4x128xf32>
    %95 = math.tanh %94 : vector<4x128xf32>
    %96 = vector.extract_strided_slice %95 {offsets = [0, 0], sizes = [2, 128], strides = [1, 1]} : vector<4x128xf32> to vector<2x128xf32>
    %97 = vector.extract_strided_slice %95 {offsets = [2, 0], sizes = [2, 128], strides = [1, 1]} : vector<4x128xf32> to vector<2x128xf32>
    %98 = vector.extract_strided_slice %82 {offsets = [0, 0], sizes = [2, 1], strides = [1, 1]} : vector<2x2xf32> to vector<2x1xf32>
    %99 = vector.broadcast %98 : vector<2x1xf32> to vector<2x128xf32>
    %100 = arith.mulf %99, %96 : vector<2x128xf32>
    %101 = vector.extract_strided_slice %82 {offsets = [0, 1], sizes = [2, 1], strides = [1, 1]} : vector<2x2xf32> to vector<2x1xf32>
    %102 = vector.broadcast %101 : vector<2x1xf32> to vector<2x128xf32>
    %103 = arith.mulf %102, %97 : vector<2x128xf32>
    %104 = arith.addf %100, %103 : vector<2x128xf32>
    %c16 = arith.constant 16 : index
    %c0_48 = arith.constant 0 : index
    %105 = vector.load %arg6[%c16, %c0_48] : memref<56x128xf32, #tpu.memory_space<vmem>>, vector<3x128xf32>
    %106 = arith.truncf %95 : vector<4x128xf32> to vector<4x128xbf16>
    %c0_49 = arith.constant 0 : index
    %c0_50 = arith.constant 0 : index
    %107 = vector.load %arg4[%c0_49, %c0_50] : memref<128x384xbf16, #tpu.memory_space<vmem>>, vector<128x384xbf16>
    %cst_51 = arith.constant dense<0.000000e+00> : vector<4x384xf32>
    %108 = tpu.matmul %106, %107, %cst_51 {dimension_numbers = #tpu.dot_dimension_numbers<[1], [0], [0], [1], [0, 0, 1, 1], [], []>} : vector<4x128xbf16>, vector<128x384xbf16>, vector<4x384xf32> -> vector<4x384xf32>
    %109 = vector.extract_strided_slice %108 {offsets = [0, 0], sizes = [4, 128], strides = [1, 1]} : vector<4x384xf32> to vector<4x128xf32>
    %110 = vector.extract_strided_slice %105 {offsets = [0, 0], sizes = [1, 128], strides = [1, 1]} : vector<3x128xf32> to vector<1x128xf32>
    %111 = vector.broadcast %110 : vector<1x128xf32> to vector<4x128xf32>
    %112 = arith.addf %109, %111 : vector<4x128xf32>
    %113 = vector.extract_strided_slice %108 {offsets = [0, 128], sizes = [4, 128], strides = [1, 1]} : vector<4x384xf32> to vector<4x128xf32>
    %114 = vector.extract_strided_slice %105 {offsets = [1, 0], sizes = [1, 128], strides = [1, 1]} : vector<3x128xf32> to vector<1x128xf32>
    %115 = vector.broadcast %114 : vector<1x128xf32> to vector<4x128xf32>
    %116 = arith.addf %113, %115 : vector<4x128xf32>
    %117 = vector.extract_strided_slice %108 {offsets = [0, 256], sizes = [4, 128], strides = [1, 1]} : vector<4x384xf32> to vector<4x128xf32>
    %118 = vector.extract_strided_slice %105 {offsets = [2, 0], sizes = [1, 128], strides = [1, 1]} : vector<3x128xf32> to vector<1x128xf32>
    %119 = vector.broadcast %118 : vector<1x128xf32> to vector<4x128xf32>
    %120 = arith.addf %117, %119 : vector<4x128xf32>
    %121 = vector.extract_strided_slice %112 {offsets = [0, 0], sizes = [2, 128], strides = [1, 1]} : vector<4x128xf32> to vector<2x128xf32>
    %122 = vector.extract_strided_slice %112 {offsets = [2, 0], sizes = [2, 128], strides = [1, 1]} : vector<4x128xf32> to vector<2x128xf32>
    %123 = vector.extract_strided_slice %116 {offsets = [0, 0], sizes = [2, 128], strides = [1, 1]} : vector<4x128xf32> to vector<2x128xf32>
    %124 = vector.extract_strided_slice %116 {offsets = [2, 0], sizes = [2, 128], strides = [1, 1]} : vector<4x128xf32> to vector<2x128xf32>
    %125 = vector.extract_strided_slice %120 {offsets = [0, 0], sizes = [2, 128], strides = [1, 1]} : vector<4x128xf32> to vector<2x128xf32>
    %126 = vector.extract_strided_slice %120 {offsets = [2, 0], sizes = [2, 128], strides = [1, 1]} : vector<4x128xf32> to vector<2x128xf32>
    %127 = arith.mulf %121, %123 : vector<2x128xf32>
    %128 = arith.mulf %121, %124 : vector<2x128xf32>
    %129 = arith.mulf %122, %123 : vector<2x128xf32>
    %130 = arith.mulf %122, %124 : vector<2x128xf32>
    %131 = tpu.concatenate %127, %128, %129, %130 in 0 : vector<2x128xf32>, vector<2x128xf32>, vector<2x128xf32>, vector<2x128xf32> -> vector<8x128xf32>
    %132 = arith.truncf %131 : vector<8x128xf32> to vector<8x128xbf16>
    %c448 = arith.constant 448 : index
    %c0_52 = arith.constant 0 : index
    %133 = vector.load %arg5[%c448, %c0_52] : memref<576x128xbf16, #tpu.memory_space<vmem>>, vector<128x2xbf16>
    %cst_53 = arith.constant dense<0.000000e+00> : vector<8x2xf32>
    %134 = tpu.matmul %132, %133, %cst_53 {dimension_numbers = #tpu.dot_dimension_numbers<[1], [0], [0], [1], [0, 0, 1, 1], [], []>} : vector<8x128xbf16>, vector<128x2xbf16>, vector<8x2xf32> -> vector<8x2xf32>
    %cst_54 = arith.constant 0.149071202 : f32
    %135 = vector.broadcast %cst_54 : f32 to vector<8x2xf32>
    %136 = arith.mulf %134, %135 : vector<8x2xf32>
    %137 = vector.extract_strided_slice %136 {offsets = [0, 0], sizes = [4, 2], strides = [1, 1]} : vector<8x2xf32> to vector<4x2xf32>
    %138 = vector.extract_strided_slice %137 {offsets = [0, 0], sizes = [2, 2], strides = [1, 1]} : vector<4x2xf32> to vector<2x2xf32>
    %139 = vector.extract_strided_slice %137 {offsets = [2, 0], sizes = [2, 2], strides = [1, 1]} : vector<4x2xf32> to vector<2x2xf32>
    %140 = arith.maximumf %138, %139 : vector<2x2xf32>
    %141 = arith.subf %138, %140 : vector<2x2xf32>
    %142 = math.exp %141 : vector<2x2xf32>
    %143 = arith.subf %139, %140 : vector<2x2xf32>
    %144 = math.exp %143 : vector<2x2xf32>
    %145 = arith.addf %142, %144 : vector<2x2xf32>
    %146 = tpu.reciprocal %145 {approx = true} : vector<2x2xf32> -> vector<2x2xf32>
    %147 = arith.mulf %142, %146 : vector<2x2xf32>
    %148 = arith.mulf %144, %146 : vector<2x2xf32>
    %149 = vector.extract_strided_slice %136 {offsets = [4, 0], sizes = [4, 2], strides = [1, 1]} : vector<8x2xf32> to vector<4x2xf32>
    %150 = vector.extract_strided_slice %149 {offsets = [0, 0], sizes = [2, 2], strides = [1, 1]} : vector<4x2xf32> to vector<2x2xf32>
    %151 = vector.extract_strided_slice %149 {offsets = [2, 0], sizes = [2, 2], strides = [1, 1]} : vector<4x2xf32> to vector<2x2xf32>
    %152 = arith.maximumf %150, %151 : vector<2x2xf32>
    %153 = arith.subf %150, %152 : vector<2x2xf32>
    %154 = math.exp %153 : vector<2x2xf32>
    %155 = arith.subf %151, %152 : vector<2x2xf32>
    %156 = math.exp %155 : vector<2x2xf32>
    %157 = arith.addf %154, %156 : vector<2x2xf32>
    %158 = tpu.reciprocal %157 {approx = true} : vector<2x2xf32> -> vector<2x2xf32>
    %159 = arith.mulf %154, %158 : vector<2x2xf32>
    %160 = arith.mulf %156, %158 : vector<2x2xf32>
    %161 = tpu.concatenate %147, %148, %159, %160 in 0 : vector<2x2xf32>, vector<2x2xf32>, vector<2x2xf32>, vector<2x2xf32> -> vector<8x2xf32>
    %c48 = arith.constant 48 : index
    %c0_55 = arith.constant 0 : index
    %162 = vector.load %arg6[%c48, %c0_55] : memref<56x128xf32, #tpu.memory_space<vmem>>, vector<2x128xf32>
    %cst_56 = arith.constant dense<0.000000e+00> : vector<8x128xf32>
    %163 = tpu.matmul %161, %162, %cst_56 {dimension_numbers = #tpu.dot_dimension_numbers<[1], [0], [0], [1], [0, 0, 1, 1], [], []>} : vector<8x2xf32>, vector<2x128xf32>, vector<8x128xf32> -> vector<8x128xf32>
    %164 = vector.extract_strided_slice %163 {offsets = [0, 0], sizes = [2, 128], strides = [1, 1]} : vector<8x128xf32> to vector<2x128xf32>
    %165 = arith.mulf %164, %125 : vector<2x128xf32>
    %166 = vector.extract_strided_slice %163 {offsets = [2, 0], sizes = [2, 128], strides = [1, 1]} : vector<8x128xf32> to vector<2x128xf32>
    %167 = arith.mulf %166, %126 : vector<2x128xf32>
    %168 = arith.addf %165, %167 : vector<2x128xf32>
    %169 = vector.extract_strided_slice %163 {offsets = [4, 0], sizes = [2, 128], strides = [1, 1]} : vector<8x128xf32> to vector<2x128xf32>
    %170 = arith.mulf %169, %125 : vector<2x128xf32>
    %171 = vector.extract_strided_slice %163 {offsets = [6, 0], sizes = [2, 128], strides = [1, 1]} : vector<8x128xf32> to vector<2x128xf32>
    %172 = arith.mulf %171, %126 : vector<2x128xf32>
    %173 = arith.addf %170, %172 : vector<2x128xf32>
    %174 = arith.addf %168, %173 : vector<2x128xf32>
    %cst_57 = arith.constant 5.000000e-01 : f32
    %175 = vector.broadcast %cst_57 : f32 to vector<2x128xf32>
    %176 = arith.mulf %175, %174 : vector<2x128xf32>
    %177 = arith.truncf %176 : vector<2x128xf32> to vector<2x128xbf16>
    %c0_58 = arith.constant 0 : index
    %c0_59 = arith.constant 0 : index
    %178 = vector.load %arg5[%c0_58, %c0_59] : memref<576x128xbf16, #tpu.memory_space<vmem>>, vector<128x128xbf16>
    %cst_60 = arith.constant dense<0.000000e+00> : vector<2x128xf32>
    %179 = tpu.matmul %177, %178, %cst_60 {dimension_numbers = #tpu.dot_dimension_numbers<[1], [0], [0], [1], [0, 0, 1, 1], [], []>} : vector<2x128xbf16>, vector<128x128xbf16>, vector<2x128xf32> -> vector<2x128xf32>
    %c24_61 = arith.constant 24 : index
    %c0_62 = arith.constant 0 : index
    %180 = vector.load %arg6[%c24_61, %c0_62] : memref<56x128xf32, #tpu.memory_space<vmem>>, vector<1x128xf32>
    %181 = vector.broadcast %180 : vector<1x128xf32> to vector<2x128xf32>
    %182 = arith.addf %179, %181 : vector<2x128xf32>
    %183 = tpu.concatenate %104, %182 in 1 : vector<2x128xf32>, vector<2x128xf32> -> vector<2x256xf32>
    %184 = arith.truncf %183 : vector<2x256xf32> to vector<2x256xbf16>
    %c128 = arith.constant 128 : index
    %c0_63 = arith.constant 0 : index
    %185 = vector.load %arg5[%c128, %c0_63] : memref<576x128xbf16, #tpu.memory_space<vmem>>, vector<256x64xbf16>
    %cst_64 = arith.constant dense<0.000000e+00> : vector<2x64xf32>
    %186 = tpu.matmul %184, %185, %cst_64 {dimension_numbers = #tpu.dot_dimension_numbers<[1], [0], [0], [1], [0, 0, 1, 1], [], []>} : vector<2x256xbf16>, vector<256x64xbf16>, vector<2x64xf32> -> vector<2x64xf32>
    %c32_65 = arith.constant 32 : index
    %c0_66 = arith.constant 0 : index
    %187 = vector.load %arg6[%c32_65, %c0_66] : memref<56x128xf32, #tpu.memory_space<vmem>>, vector<1x64xf32>
    %188 = vector.broadcast %187 : vector<1x64xf32> to vector<2x64xf32>
    %189 = arith.addf %186, %188 : vector<2x64xf32>
    %cst_67 = arith.constant 0.000000e+00 : f32
    %190 = vector.broadcast %cst_67 : f32 to vector<2x64xf32>
    %191 = arith.maximumf %189, %190 : vector<2x64xf32>
    %192 = arith.truncf %191 : vector<2x64xf32> to vector<2x64xbf16>
    %c384 = arith.constant 384 : index
    %c0_68 = arith.constant 0 : index
    %193 = vector.load %arg5[%c384, %c0_68] : memref<576x128xbf16, #tpu.memory_space<vmem>>, vector<64x128xbf16>
    %cst_69 = arith.constant dense<0.000000e+00> : vector<2x128xf32>
    %194 = tpu.matmul %192, %193, %cst_69 {dimension_numbers = #tpu.dot_dimension_numbers<[1], [0], [0], [1], [0, 0, 1, 1], [], []>} : vector<2x64xbf16>, vector<64x128xbf16>, vector<2x128xf32> -> vector<2x128xf32>
    %c40 = arith.constant 40 : index
    %c0_70 = arith.constant 0 : index
    %195 = vector.load %arg6[%c40, %c0_70] : memref<56x128xf32, #tpu.memory_space<vmem>>, vector<1x128xf32>
    %196 = vector.broadcast %195 : vector<1x128xf32> to vector<2x128xf32>
    %197 = arith.addf %194, %196 : vector<2x128xf32>
    %198 = arith.addf %104, %197 : vector<2x128xf32>
    %c0_71 = arith.constant 0 : index
    %c0_72 = arith.constant 0 : index
    %199 = vector.load %arg7[%c0_71, %c0_72] : memref<2x128xf32, #tpu.memory_space<vmem>>, vector<2x128xf32>
    tpu.vector_store %arg7[%c0_71, %c0_72], %198 {strides = array<i32>} : memref<2x128xf32, #tpu.memory_space<vmem>>, vector<2x128xf32>,
    return
  }
}

</mosaic_0001>

<bundles_post_ra>
// kernel: moe_v2_forward.1
= control target key start
LH: loop header
LB: loop body
LE: loop exit
PB: predicated region body
PF: predicated region fallthrough
CT: control target
= control target key end

     0   :  { %14 = vsyncpa [#allocation3], 0  ;;  %s3509_s0 = inlined_call_operand.vmem [shape: f32[2,64], index: 0, kind: input, shape index: {}]   ;;  %s3510_s1 = inlined_call_operand.vmem [shape: f32[2,16,4], index: 1, kind: input, shape index: {}]   ;;  %s3511_s2 = inlined_call_operand.hbm [shape: f32[72,768], index: 2, kind: input, shape index: {}]   ;;  %s3512_s3 = inlined_call_operand.hbm [shape: f32[920,128], index: 3, kind: input, shape index: {}]   ;;  %s3513_s4 = inlined_call_operand.hbm [shape: bf16[128,384], index: 4, kind: input, shape index: {}]   ;;  %s3514_s5 = inlined_call_operand.hbm [shape: bf16[576,128], index: 5, kind: input, shape index: {}]   ;;  %s3515_s6 = inlined_call_operand.vmem [shape: f32[56,128], index: 6, kind: input, shape index: {}]   ;;  %s3516_s7 = inlined_call_operand.hbm [shape: f32[2,128], index: 7, kind: output, shape index: {0}]   ;;  %s3517_s8 = inlined_call_operand.hbm [shape: f32[2,2], index: 8, kind: output, shape index: {1}]  }
   0x1   :  { %15 = vsyncpa [#allocation6], 0 }
   0x2   :  { %16 = vsyncpa [#allocation9], 0 }
   0x3   :  { %17 = vsyncpa [#allocation4], 0 }
   0x4   :  { %18 = vsyncpa [#allocation12], 0  ;;  %s3123_s27 = smov [#allocation5]   ;;  %s2981_s9 = scalar_lea.hbm %s3512_s3, 14720 }
   0x5   :  { %s40_s28 = sshll.u32 %s3123_s27, 4  ;;  %p2982_p0 = scmp.ne.s32.totalorder %s3512_s3, %s2981_s9  ;;  %s41_s28 = int_to_ptr.vmem [resolvable:$true] %s40_s28 }
   0x6   :  { %p2985_p1 = scmp.lt.u32.totalorder %s2981_s9, %s3512_s3 }
   0x8   :  { %p2987_p2 = pnand %p2985_p1, %p2982_p0 }
   0xa   :  { %2990 = shalt.err (!%p2987_p2)
}
   0xb   :  { %s2991_s14 = scalar_lea.vmem %s41_s28, 14720  ;;  %p2996_p4 = scmp.lt.s32.totalorder %s41_s28, %s41_s28 }
   0xc   :  { %p2992_p3 = scmp.ne.s32.totalorder %s41_s28, %s2991_s14  ;;  %p2997_p5 = scmp.lt.s32.totalorder %s2991_s14, %s2991_s14 }
   0xe   :  { %p2998_p6 = por %p2997_p5, %p2996_p4 }
  0x10   :  { %p2999_p7 = pnand %p2998_p6, %p2992_p3 }
  0x12   :  { %3002 = shalt.err (!%p2999_p7)
}
  0x13   :  { %s3124_s15 = smov 128   ;;  %s3125_s16 = smov 8  }
  0x14   :  { %46 = dma.hbm_to_vmem [thread:$0]  %s3512_s3, 14720, %s41_s28, [#allocation6], %s3124_s15, %s3124_s15, %s3125_s16  }
  0x15   :  { %s3126_s19 = smov [#allocation2]   ;;  %s3003_s23 = scalar_lea.hbm %s3511_s2, 6912 }
  0x16   :  { %s28_s20 = sshll.u32 %s3126_s19, 4  ;;  %p3004_p8 = scmp.ne.s32.totalorder %s3511_s2, %s3003_s23  ;;  %s29_s20 = int_to_ptr.vmem [resolvable:$true] %s28_s20 }
  0x17   :  { %p3007_p9 = scmp.lt.u32.totalorder %s3003_s23, %s3511_s2 }
  0x19   :  { %p3009_p10 = pnand %p3007_p9, %p3004_p8 }
  0x1b   :  { %3012 = shalt.err (!%p3009_p10)
}
  0x1c   :  { %s3013_s29 = scalar_lea.vmem %s29_s20, 6912  ;;  %p3018_p12 = scmp.lt.s32.totalorder %s29_s20, %s29_s20 }
  0x1d   :  { %p3014_p11 = scmp.ne.s32.totalorder %s29_s20, %s3013_s29  ;;  %p3019_p13 = scmp.lt.s32.totalorder %s3013_s29, %s3013_s29 }
  0x1f   :  { %p3020_p0 = por %p3019_p13, %p3018_p12 }
  0x21   :  { %p3021_p1 = pnand %p3020_p0, %p3014_p11 }
  0x23   :  { %3024 = shalt.err (!%p3021_p1)
}
  0x24   :  { %s3127_s3 = smov 768   ;;  %s3128_s28 = smov 48  }
  0x25   :  { %34 = dma.hbm_to_vmem [thread:$0]  %s3511_s2, 6912, %s29_s20, [#allocation3], %s3127_s3, %s3127_s3, %s3128_s28  }
  0x26   :  { %s3129_s10 = smov [#allocation7]   ;;  %s3025_s14 = scalar_lea.hbm %s3513_s4, 3072 }
  0x27   :  { %s52_s11 = sshll.u32 %s3129_s10, 4  ;;  %p3026_p2 = scmp.ne.s32.totalorder %s3513_s4, %s3025_s14  ;;  %s53_s11 = int_to_ptr.vmem [resolvable:$true] %s52_s11 }
  0x28   :  { %p3029_p3 = scmp.lt.u32.totalorder %s3025_s14, %s3513_s4 }
  0x2a   :  { %p3031_p4 = pnand %p3029_p3, %p3026_p2 }
  0x2c   :  { %3034 = shalt.err (!%p3031_p4)
}
  0x2d   :  { %s3035_s21 = scalar_lea.vmem %s53_s11, 3072  ;;  %p3040_p6 = scmp.lt.s32.totalorder %s53_s11, %s53_s11 }
  0x2e   :  { %p3036_p5 = scmp.ne.s32.totalorder %s53_s11, %s3035_s21  ;;  %p3041_p7 = scmp.lt.s32.totalorder %s3035_s21, %s3035_s21 }
  0x30   :  { %p3042_p8 = por %p3041_p7, %p3040_p6 }
  0x32   :  { %p3043_p9 = pnand %p3042_p8, %p3036_p5 }
  0x34   :  { %3046 = shalt.err (!%p3043_p9)
}
  0x35   :  { %s3130_s2 = smov 192   ;;  %s3131_s20 = smov 12  }
  0x36   :  { %58 = dma.hbm_to_vmem [thread:$0]  %s3513_s4, 3072, %s53_s11, [#allocation6], %s3130_s2, %s3130_s2, %s3131_s20  }
  0x37   :  { %s3132_s24 = smov [#allocation8]   ;;  %s3047_s29 = scalar_lea.hbm %s3514_s5, 4608 }
  0x38   :  { %s64_s25 = sshll.u32 %s3132_s24, 4  ;;  %p3048_p10 = scmp.ne.s32.totalorder %s3514_s5, %s3047_s29  ;;  %s65_s25 = int_to_ptr.vmem [resolvable:$true] %s64_s25 }
  0x39   :  { %p3051_p11 = scmp.lt.u32.totalorder %s3047_s29, %s3514_s5 }
  0x3b   :  { %p3053_p12 = pnand %p3051_p11, %p3048_p10 }
  0x3d   :  { %3056 = shalt.err (!%p3053_p12)
}
  0x3e   :  { %s3057_s10 = scalar_lea.vmem %s65_s25, 4608  ;;  %p3062_p0 = scmp.lt.s32.totalorder %s65_s25, %s65_s25 }
  0x3f   :  { %p3058_p13 = scmp.ne.s32.totalorder %s65_s25, %s3057_s10  ;;  %p3063_p1 = scmp.lt.s32.totalorder %s3057_s10, %s3057_s10 }
  0x41   :  { %p3064_p2 = por %p3063_p1, %p3062_p0 }
  0x43   :  { %p3065_p3 = pnand %p3064_p2, %p3058_p13 }
  0x45   :  { %3068 = shalt.err (!%p3065_p3)
}
  0x46   :  { %s3133_s4 = smov 64   ;;  %s3134_s11 = smov 4  }
  0x47   :  { %70 = dma.hbm_to_vmem [thread:$0]  %s3514_s5, 4608, %s65_s25, [#allocation9], %s3133_s4, %s3133_s4, %s3134_s11  }
  0x48   :  { %3113 = dma.done.wait [#allocation3], 6912  }
  0x49   :  { %3114 = vsyncadd [#allocation3], 4294960384 }
  0x4a   :  { %3115 = dma.done.wait [#allocation6], 17792  }
  0x4b   :  { %3116 = vsyncadd [#allocation6], 4294949504 }
  0x4c   :  { %3117 = dma.done.wait [#allocation9], 4608  }
  0x4d   :  { %3118 = vsyncadd [#allocation9], 4294962688  ;;  %v3135_v0 = vmov 0.0   ;;  %vm397_vm0 = vcmask 31744   ;;  %v3245_v1 = vld [vmem:[%s3510_s1] sm:$0xff]  ;;  %v3250_v2 = vld [vmem:[%s3510_s1 + $0x8] sm:$0xff] }
  0x4e   :  { %313 = vmatprep.mubr.f32.mxu1 %v3135_v0  ;;  %242 = vmatprep.mubr.f32.mxu0 %v3135_v0  ;;  %v3255_v3 = vld [vmem:[%s3510_s1 + $0x10] sm:$0xff]  ;;  %v3260_v4 = vld [vmem:[%s3510_s1 + $0x18] sm:$0xff]  ;;  %v399_v5 = vsel %vm397_vm0, %v3250_v2, 0.0  ;;  %v461_v7 = vsel %vm397_vm0, %v3245_v1, inf  ;;  %v462_v8 = vsel %vm397_vm0, %v3250_v2, inf  ;;  %v398_v15 = vsel %vm397_vm0, %v3245_v1, 0.0 }
  0x4f   :  { %v407_v6 = vsel %vm397_vm0, %v3255_v3, 0.0  ;;  %v408_v9 = vsel %vm397_vm0, %v3260_v4, 0.0  ;;  %v463_v10 = vmin.f32 %v461_v7, %v462_v8  ;;  %v470_v11 = vsel %vm397_vm0, %v3255_v3, inf  ;;  %v94_v58 = vld [vmem:[#allocation2 + $0x18] sm:$0xff]  ;;  %s3136_s1 = smov 16   ;;  %s3142_s4 = smov [#allocation11]  }
  0x50   :  { %v471_v12 = vsel %vm397_vm0, %v3260_v4, inf  ;;  %v409_v13 = vadd.f32 %v408_v9, %v407_v6  ;;  %v479_v16 = vsel %vm397_vm0, %v3245_v1, -inf  ;;  %v400_v18 = vadd.f32 %v399_v5, %v398_v15  ;;  %v100_v5 = vld [vmem:[#allocation2 + $0x48] sm:$0xff]  ;;  %v106_v15 = vld [vmem:[#allocation2 + $0x78] sm:$0xff] }
  0x51   :  { %v472_v14 = vmin.f32 %v470_v11, %v471_v12  ;;  %v464_v17 = vrot.slane %v463_v10, 4  ;;  %v480_v19 = vsel %vm397_vm0, %v3250_v2, -inf  ;;  %v488_v20 = vsel %vm397_vm0, %v3255_v3, -inf  ;;  %v99_v11 = vld [vmem:[#allocation2 + $0x40] sm:$0xff] }
  0x52   :  { %v410_v21 = vrot.slane %v409_v13, 4  ;;  %v481_v23 = vmax.f32 %v479_v16, %v480_v19  ;;  %v489_v24 = vsel %vm397_vm0, %v3260_v4, -inf  ;;  %v401_v26 = vrot.slane %v400_v18, 4  ;;  %v112_v16 = vld [vmem:[#allocation2 + $0xa8] sm:$0xff] }
  0x53   :  { %v473_v22 = vrot.slane %v472_v14, 4  ;;  %v465_v25 = vmin.f32 %v463_v10, %v464_v17  ;;  %v490_v27 = vmax.f32 %v488_v20, %v489_v24  ;;  %v499_v28 = vrot.slane %v3250_v2, 2  ;;  %v93_v10 = vld [vmem:[#allocation2 + $0x10] sm:$0xff]  ;;  %v111_v24 = vld [vmem:[#allocation2 + $0xa0] sm:$0xff] }
  0x54   :  { %v411_v29 = vadd.f32 %v410_v21, %v409_v13  ;;  %v482_v31 = vrot.slane %v481_v23, 4  ;;  %v500_v32 = vrot.slane %v3260_v4, 2  ;;  %v402_v34 = vadd.f32 %v401_v26, %v400_v18 }
  0x55   :  { %v474_v30 = vmin.f32 %v472_v14, %v473_v22  ;;  %v466_v33 = vrot.slane %v465_v25, 2  ;;  %v491_v35 = vrot.slane %v490_v27, 4  ;;  %v503_v36 = vsub.f32 %v3250_v2, %v499_v28  ;;  %v124_v28 = vld [vmem:[#allocation2 + $0x108] sm:$0xff] }
  0x56   :  { %v412_v37 = vrot.slane %v411_v29, 2  ;;  %v483_v39 = vmax.f32 %v481_v23, %v482_v31  ;;  %v504_v40 = vsub.f32 %v3260_v4, %v500_v32  ;;  %v403_v42 = vrot.slane %v402_v34, 2  ;;  %v105_v23 = vld [vmem:[#allocation2 + $0x70] sm:$0xff] }
  0x57   :  { %v475_v38 = vrot.slane %v474_v30, 2  ;;  %v467_v41 = vmin.f32 %v465_v25, %v466_v33  ;;  %v492_v43 = vmax.f32 %v490_v27, %v491_v35  ;;  %v505_v44 = vmul.f32 0.14285715, %v503_v36  ;;  %v118_v25 = vld [vmem:[#allocation2 + $0xd8] sm:$0xff]  ;;  %v117_v36 = vld [vmem:[#allocation2 + $0xd0] sm:$0xff] }
  0x58   :  { %v413_v45 = vadd.f32 %v412_v37, %v411_v29  ;;  %v484_v47 = vrot.slane %v483_v39, 2  ;;  %v506_v48 = vmul.f32 0.14285715, %v504_v40  ;;  %v404_v50 = vadd.f32 %v403_v42, %v402_v34  ;;  %v123_v40 = vld [vmem:[#allocation2 + $0x100] sm:$0xff] }
  0x59   :  { %v476_v46 = vmin.f32 %v474_v30, %v475_v38  ;;  %v468_v49 = vrot.slane %v467_v41, 1  ;;  %v493_v51 = vrot.slane %v492_v43, 2  ;;  %vm529_vm1 = vcmask 1041409  }
  0x5a   :  { %v414_v52 = vrot.slane %v413_v45, 1  ;;  %v485_v54 = vmax.f32 %v483_v39, %v484_v47  ;;  %v405_v56 = vrot.slane %v404_v50, 1  ;;  %v552_v9 = vrot.slane %v505_v44, 7 }
  0x5b   :  { %v477_v53 = vrot.slane %v476_v46, 1  ;;  %v469_v55 = vmin.f32 %v467_v41, %v468_v49  ;;  %v494_v57 = vmax.f32 %v492_v43, %v493_v51  ;;  %v553_v14 = vrot.slane %v506_v48, 6  ;;  %v130_v41 = vld [vmem:[#allocation2 + $0x138] sm:$0xff] }
  0x5c   :  { %v415_v59 = vadd.f32 %v414_v52, %v413_v45  ;;  %v486_v61 = vrot.slane %v485_v54, 1  ;;  %v406_v62 = vadd.f32 %v405_v56, %v404_v50  ;;  %v2727_v19 = vpack.c.bf16 %v100_v5, %v94_v58  ;;  %v136_v45 = vld [vmem:[#allocation2 + $0x168] sm:$0xff]  ;;  %v129_v52 = vld [vmem:[#allocation2 + $0x130] sm:$0xff]  ;;  %v135_v56 = vld [vmem:[#allocation2 + $0x160] sm:$0xff] }
  0x5d   :  { %v478_v60 = vmin.f32 %v476_v46, %v477_v53  ;;  %v495_v63 = vrot.slane %v494_v57, 1  ;;  %v554_v31 = vsel %vm529_vm1, %v553_v14, %v552_v9  ;;  %v2729_v32 = vpack.c.bf16 %v99_v11, %v93_v10 }
  0x5e   :  { %v418_v6 = vmul.f32 0.0625, %v415_v59  ;;  %v487_v8 = vmax.f32 %v485_v54, %v486_v61  ;;  %v417_v12 = vmul.f32 0.0625, %v406_v62  ;;  %2728 = vmatprep.subr.bf16.mxu1 %v2727_v19  ;;  %v2731_v35 = vpack.c.bf16 %v112_v16, %v106_v15  ;;  %v575_v61 = vld [vmem:[#allocation5] sm:$0xff]  ;;  %v576_v62 = vld [vmem:[#allocation5 + $0x8] sm:$0xff] }
  0x5f   :  { %v540_v7 = vsel %vm529_vm1, %v478_v60, %v469_v55  ;;  %v496_v13 = vmax.f32 %v494_v57, %v495_v63  ;;  %2730 = vmatpush1.bf16.msra.mxu1 %v2729_v32  ;;  %v2733_v43 = vpack.c.bf16 %v111_v24, %v105_v23  ;;  %v2735_v44 = vpack.c.bf16 %v124_v28, %v118_v25  ;;  %v98_v24 = vld [vmem:[#allocation2 + $0x38] sm:$0xff]  ;;  %v91_v25 = vld [vmem:[#allocation2] sm:$0xff]  ;;  %v104_v28 = vld [vmem:[#allocation2 + $0x68] sm:$0xff] }
  0x60   :  { %541 = vrot.lane.b32.xlu0 %v540_v7, %s3125_s16  ;;  %v421_v17 = vsub.f32 %v3255_v3, %v418_v6  ;;  %v422_v18 = vsub.f32 %v3260_v4, %v418_v6  ;;  %v419_v20 = vsub.f32 %v3245_v1, %v417_v12  ;;  %v420_v21 = vsub.f32 %v3250_v2, %v417_v12 }
  0x61   :  { %v546_v22 = vsel %vm529_vm1, %v496_v13, %v487_v8  ;;  %2732 = vmatprep.subr.bf16.mxu1 %v2731_v35  ;;  %v507_v47 = vmul.f32 2.0, %v3250_v2  ;;  %v508_v49 = vmul.f32 2.0, %v3260_v4  ;;  %v2737_v51 = vpack.c.bf16 %v123_v40, %v117_v36  ;;  %v3313_v8 = vld [vmem:[%s3509_s0] sm:$0x3]  ;;  %v103_v35 = vld [vmem:[#allocation2 + $0x60] sm:$0xff]  ;;  %v109_v36 = vld [vmem:[#allocation2 + $0x90] sm:$0xff] }
  0x62   :  { %v425_v26 = vmul.f32 %v421_v17, %v421_v17  ;;  %v426_v27 = vmul.f32 %v422_v18, %v422_v18  ;;  %547 = vrot.lane.b32.xlu1 %v546_v22, %s3131_s20  ;;  %v423_v29 = vmul.f32 %v419_v20, %v419_v20  ;;  %v424_v30 = vmul.f32 %v420_v21, %v420_v21  ;;  %v577_v22 = vld [vmem:[#allocation5 + $0x10] sm:$0xff]  ;;  %s3139_s0 = smov 20  }
  0x63   :  { %2734 = vmatpush1.bf16.msra.mxu1 %v2733_v43  ;;  %v3306_v53 = vsel %vm529_vm1, %v418_v6, %v417_v12  ;;  %v2739_v55 = vpack.c.bf16 %v136_v45, %v130_v41  ;;  %v511_v58 = vrot.slane %v507_v47, 2  ;;  %v512_v60 = vrot.slane %v508_v49, 2  ;;  %v115_v47 = vld [vmem:[#allocation2 + $0xc0] sm:$0xff] }
  0x64   :  { %v436_v33 = vsel %vm397_vm0, %v425_v26, 0.0  ;;  %v437_v34 = vsel %vm397_vm0, %v426_v27, 0.0  ;;  %v427_v38 = vsel %vm397_vm0, %v423_v29, 0.0  ;;  %v428_v39 = vsel %vm397_vm0, %v424_v30, 0.0  ;;  %2736 = vmatprep.subr.bf16.mxu1 %v2735_v44  ;;  %v97_v27 = vld [vmem:[#allocation2 + $0x30] sm:$0xff]  ;;  %v110_v29 = vld [vmem:[#allocation2 + $0x98] sm:$0xff] }
  0x65   :  { %v438_v37 = vadd.f32 %v437_v34, %v436_v33  ;;  %v429_v42 = vadd.f32 %v428_v39, %v427_v38  ;;  %v2741_v5 = vpack.c.bf16 %v135_v56, %v129_v52  ;;  %vm174_vm2 = vcmask 523264   ;;  %v122_v39 = vld [vmem:[#allocation2 + $0xf8] sm:$0xff] }
  0x66   :  { %555 = vrot.lane.b32.xlu1 %v554_v31, %s3136_s1  ;;  %v2760_v11 = vpack.c.bf16 %v576_v62, %v575_v61  ;;  %v3137_v13 = vmov 0.0|0.0   ;;  %v515_v16 = vsub.f32 %v3250_v2, %v511_v58  ;;  %v519_v17 = vrot.slane %v3245_v1, 3  ;;  %v92_v1 = vld [vmem:[#allocation2 + $0x8] sm:$0xff]  ;;  %v133_v58 = vld [vmem:[#allocation2 + $0x150] sm:$0xff] }
  0x67   :  { %v439_v46 = vrot.slane %v438_v37, 4  ;;  %v430_v48 = vrot.slane %v429_v42, 4  ;;  %2738 = vmatpush1.bf16.msra.mxu1 %v2737_v51  ;;  %v516_v18 = vsub.f32 %v3260_v4, %v512_v60  ;;  %v520_v19 = vrot.slane %v3255_v3, 3  ;;  %v134_v51 = vld [vmem:[#allocation2 + $0x158] sm:$0xff] }
  0x68   :  { %2740 = vmatprep.subr.bf16.mxu1 %v2739_v55  ;;  %v523_v20 = vadd.f32 %v519_v17, %v515_v16  ;;  %vm3138_vm3 = vmmov 0   ;;  %v2711_v26 = vpack.c.bf16 %v98_v24, %v92_v1  ;;  %v2713_v33 = vpack.c.bf16 %v97_v27, %v91_v25  ;;  %v102_v60 = vld [vmem:[#allocation2 + $0x58] sm:$0xff]  ;;  %v119_v16 = vld [vmem:[#allocation2 + $0xe0] sm:$0xff]  ;;  %v125_v17 = vld [vmem:[#allocation2 + $0x110] sm:$0xff] }
  0x69   :  { %v440_v50 = vadd.f32 %v439_v46, %v438_v37  ;;  %v431_v54 = vadd.f32 %v430_v48, %v429_v42  ;;  %v524_v21 = vadd.f32 %v520_v19, %v516_v18  ;;  %v2715_v34 = vpack.c.bf16 %v110_v29, %v104_v28  ;;  %v116_v37 = vld [vmem:[#allocation2 + $0xc8] sm:$0xff]  ;;  %v121_v48 = vld [vmem:[#allocation2 + $0xf0] sm:$0xff]  ;;  %v789_v25 = vld [vmem:[#allocation5 + $0x1c8] sm:$0xff] }
  0x6a   :  { %1306 = vrot.lane.b32.xlu1 %v3306_v53, %s3134_s11  ;;  %v525_v23 = vmul.f32 0.020408163, %v523_v20  ;;  %2712 = vmatprep.subr.bf16.mxu0 %v2711_v26  ;;  %v2717_v42 = vpack.c.bf16 %v109_v36, %v103_v35  ;;  %v2719_v46 = vpack.c.bf16 %v122_v39, %v116_v37  ;;  %v132_v19 = vld [vmem:[#allocation2 + $0x148] sm:$0xff]  ;;  %v138_v20 = vld [vmem:[#allocation2 + $0x178] sm:$0xff]  ;;  %v137_v1 = vld [vmem:[#allocation2 + $0x170] sm:$0xff]  ;;  %vm567_vm8 = vcmask 64512  }
  0x6b   :  { %v441_v57 = vrot.slane %v440_v50, 2  ;;  %v432_v59 = vrot.slane %v431_v54, 2  ;;  %2742 = vmatpush1.bf16.msra.mxu1 %v2741_v5  ;;  %v526_v2 = vmul.f32 0.020408163, %v524_v21  ;;  %2714 = vmatpush1.bf16.msra.mxu0 %v2713_v33  ;;  %v101_v5 = vld [vmem:[#allocation2 + $0x50] sm:$0xff]  ;;  %v773_v27 = vld [vmem:[#allocation5 + $0x148] sm:$0xff] }
  0x6c   :  { %2759 = vmatprep.subr.bf16.mxu1 %v3137_v13  ;;  %v560_v41 = vrot.slane %v525_v23, 7  ;;  %2716 = vmatprep.subr.bf16.mxu0 %v2715_v34  ;;  %v2755_v23 = vpack.c.bf16 %v138_v20, %v132_v19  ;;  %v788_v24 = vld [vmem:[#allocation5 + $0x1c0] sm:$0xff]  ;;  %v790_v28 = vld [vmem:[#allocation5 + $0x1d0] sm:$0xff]  ;;  %v791_v29 = vld [vmem:[#allocation5 + $0x1d8] sm:$0xff]  ;;  %vm569_vm9 = vcmask 97280   ;;  %vm571_vm10 = vcmask 130048  }
  0x6d   :  { %v442_v63 = vadd.f32 %v441_v57, %v440_v50  ;;  %v433_v7 = vadd.f32 %v432_v59, %v431_v54  ;;  %v561_v45 = vrot.slane %v526_v2, 6  ;;  %v128_v50 = vld [vmem:[#allocation2 + $0x128] sm:$0xff]  ;;  %v2721_v54 = vpack.c.bf16 %v121_v48, %v115_v47  ;;  %v127_v57 = vld [vmem:[#allocation2 + $0x120] sm:$0xff]  ;;  %v772_v26 = vld [vmem:[#allocation5 + $0x140] sm:$0xff] }
  0x6e   :  { %2325 = vmatmul.mubr.msk.f32.vlgmr.msra.gmra.mrb[0].mxu1 %vm174_vm2, %v3313_v8  ;;  %v2723_v56 = vpack.c.bf16 %v134_v51, %v128_v50  ;;  %v96_v59 = vld [vmem:[#allocation2 + $0x28] sm:$0xff]  ;;  %v2725_v61 = vpack.c.bf16 %v133_v58, %v127_v57  ;;  %v131_v2 = vld [vmem:[#allocation2 + $0x140] sm:$0xff]  ;;  %v792_v34 = vld [vmem:[#allocation5 + $0x1e0] sm:$0xff]  ;;  %vm573_vm11 = vcmask 162816   ;;  %vm583_vm12 = vcmask 195584  }
  0x6f   :  { %v443_v6 = vrot.slane %v442_v63, 1  ;;  %v434_v9 = vrot.slane %v433_v7, 1  ;;  %2761 = vmatpush3.bf16.msra.mxu1 %v2760_v11  ;;  %2592 = vmatprep.mubr.msk.f32.mxu1 %vm3138_vm3, %v3135_v0  ;;  %v562_v55 = vsel %vm529_vm1, %v561_v45, %v560_v41  ;;  %v2743_v62 = vpack.c.bf16 %v102_v60, %v96_v59  ;;  %v107_v11 = vld [vmem:[#allocation2 + $0x80] sm:$0xff]  ;;  %v775_v33 = vld [vmem:[#allocation5 + $0x158] sm:$0xff]  ;;  %v793_v35 = vld [vmem:[#allocation5 + $0x1e8] sm:$0xff] }
  0x70   :  { %2590 = vmatprep.subr.mxu1 %v3135_v0  ;;  %2718 = vmatpush1.bf16.msra.mxu0 %v2717_v42  ;;  %v2805_v37 = vpack.c.bf16 %v793_v35, %v792_v34  ;;  %v777_v39 = vld [vmem:[#allocation5 + $0x168] sm:$0xff]  ;;  %v795_v41 = vld [vmem:[#allocation5 + $0x1f8] sm:$0xff]  ;;  %v798_v51 = vld [vmem:[#allocation5 + $0x210] sm:$0xff]  ;;  %vm1136_vm13 = vcmask 261120   ;;  %vm1313_vm14 = vcmask 1041408   ;;  %vm1322_vm15 = vcmask 1040384  }
  0x71   :  { %v444_v10 = vadd.f32 %v443_v6, %v442_v63  ;;  %v435_v12 = vadd.f32 %v434_v9, %v433_v7  ;;  %2720 = vmatprep.subr.bf16.mxu0 %v2719_v46  ;;  %v95_v63 = vld [vmem:[#allocation2 + $0x20] sm:$0xff]  ;;  %v108_v7 = vld [vmem:[#allocation2 + $0x88] sm:$0xff]  ;;  %v114_v6 = vld [vmem:[#allocation2 + $0xb8] sm:$0xff] }
  0x72   :  { %v2745_v9 = vpack.c.bf16 %v101_v5, %v95_v63  ;;  %v779_v45 = vld [vmem:[#allocation5 + $0x178] sm:$0xff]  ;;  %v796_v46 = vld [vmem:[#allocation5 + $0x200] sm:$0xff]  ;;  %v797_v47 = vld [vmem:[#allocation5 + $0x208] sm:$0xff] }
  0x73   :  { %v446_v14 = vmul.f32 0.06666667, %v444_v10  ;;  %v445_v15 = vmul.f32 0.06666667, %v435_v12  ;;  %2591 = vmatpush3.msra.mxu1 %v577_v22  ;;  %v2747_v10 = vpack.c.bf16 %v114_v6, %v108_v7  ;;  %v113_v12 = vld [vmem:[#allocation2 + $0xb0] sm:$0xff]  ;;  %v2753_v22 = vpack.c.bf16 %v125_v17, %v119_v16  ;;  %v781_v50 = vld [vmem:[#allocation5 + $0x188] sm:$0xff] }
  0x74   :  { %2762 = vmatprep.subr.bf16.mxu1 %v3137_v13  ;;  %2722 = vmatpush1.bf16.msra.mxu0 %v2721_v54  ;;  %v2749_v18 = vpack.c.bf16 %v113_v12, %v107_v11  ;;  %v783_v57 = vld [vmem:[#allocation5 + $0x198] sm:$0xff]  ;;  %v800_v58 = vld [vmem:[#allocation5 + $0x220] sm:$0xff]  ;;  %v801_v59 = vld [vmem:[#allocation5 + $0x228] sm:$0xff] }
  0x75   :  { %2965 = vrsqrt.f32 %v446_v14  ;;  %vm456_vm4 = vcmp.eq.f32.partialorder %v446_v14, inf  ;;  %vm449_vm5 = vcmp.eq.f32.partialorder %v445_v15, inf  ;;  %vm458_vm6 = vcmp.eq.f32.partialorder %v446_v14, 0.0  ;;  %2724 = vmatprep.subr.bf16.mxu0 %v2723_v56  ;;  %v782_v56 = vld [vmem:[#allocation5 + $0x190] sm:$0xff]  ;;  %v785_v63 = vld [vmem:[#allocation5 + $0x1a8] sm:$0xff]  ;;  %v803_v6 = vld [vmem:[#allocation5 + $0x238] sm:$0xff] }
  0x76   :  { %2967 = vrsqrt.f32 %v445_v15  ;;  %v459_v3 = vand.u32 2147483648, %v446_v14  ;;  %v452_v31 = vand.u32 2147483648, %v445_v15  ;;  %vm451_vm7 = vcmp.eq.f32.partialorder %v445_v15, 0.0  ;;  %v802_v7 = vld [vmem:[#allocation5 + $0x230] sm:$0xff]  ;;  %v787_v11 = vld [vmem:[#allocation5 + $0x1b8] sm:$0xff]  ;;  %v658_v17 = vld [vmem:[#allocation5 + $0x20] sm:$0xff] }
  0x77   :  { %v2819_v60 = vpack.c.bf16 %v783_v57, %v782_v56 }
  0x78   :  { %2726 = vmatpush1.bf16.msra.mxu0 %v2725_v61  ;;  %v2821_v61 = vpack.c.bf16 %v801_v59, %v800_v58 }
  0x79   :  { %2744 = vmatprep.subr.bf16.mxu0 %v2743_v62  ;;  %v784_v62 = vld [vmem:[#allocation5 + $0x1a0] sm:$0xff] }
  0x7a   :  { %v2823_v5 = vpack.c.bf16 %v785_v63, %v784_v62  ;;  %v743_v62 = vld [vmem:[#allocation5 + $0x58] sm:$0xff]  ;;  %v760_v63 = vld [vmem:[#allocation5 + $0xe0] sm:$0xff] }
  0x7b   :  { %2324 = vmatmul.mubr.msk.f32.vlgmr.msra.gmra.mrb[0].mxu0 %vm174_vm2, %v3313_v8 }
  0x7c   :  { %2746 = vmatpush1.bf16.msra.mxu0 %v2745_v9  ;;  %384 = vmatprep.mubr.f32.mxu0 %v3135_v0  ;;  %v786_v9 = vld [vmem:[#allocation5 + $0x1b0] sm:$0xff] }
  0x7d   :  { %2748 = vmatprep.subr.bf16.mxu0 %v2747_v10  ;;  %v2825_v10 = vpack.c.bf16 %v803_v6, %v802_v7  ;;  %v2827_v12 = vpack.c.bf16 %v787_v11, %v786_v9  ;;  %v744_v9 = vld [vmem:[#allocation5 + $0x60] sm:$0xff]  ;;  %v762_v11 = vld [vmem:[#allocation5 + $0xf0] sm:$0xff] }
  0x7f   :  { %v2966_v4 = vpop.eup %2965 }
  0x80   :  { %v2968_v30 = vpop.eup %2967  ;;  %v455_v32 = vmul.f32 %v2966_v4, %v446_v14  ;;  %2750 = vmatpush1.bf16.msra.mxu0 %v2749_v18  ;;  %v2757_v4 = vpack.c.bf16 %v137_v1, %v131_v2  ;;  %v659_v18 = vld [vmem:[#allocation5 + $0x28] sm:$0xff] }
  0x81   :  { %v448_v38 = vmul.f32 %v2968_v30, %v445_v15  ;;  %v2799_v30 = vpack.c.bf16 %v773_v27, %v772_v26  ;;  %v141_v26 = vld [vmem:[#allocation2 + $0x180] ss:$8 sm:$0x30] }
  0x82   :  { %v457_v40 = vsel %vm456_vm4, %v446_v14, %v455_v32  ;;  %v120_v14 = vld [vmem:[#allocation2 + $0xe8] sm:$0xff]  ;;  %v774_v32 = vld [vmem:[#allocation5 + $0x150] sm:$0xff]  ;;  %vm1692_vm4 = vcmask 1043456  }
  0x83   :  { %v450_v43 = vsel %vm449_vm5, %v445_v15, %v448_v38  ;;  %v460_v44 = vsel %vm458_vm6, %v459_v3, %v457_v40  ;;  %v126_v15 = vld [vmem:[#allocation2 + $0x118] sm:$0xff]  ;;  %v2797_v3 = vpack.c.bf16 %v789_v25, %v788_v24  ;;  %v2803_v36 = vpack.c.bf16 %v775_v33, %v774_v32  ;;  %v776_v38 = vld [vmem:[#allocation5 + $0x160] sm:$0xff]  ;;  %v794_v40 = vld [vmem:[#allocation5 + $0x1f0] sm:$0xff] }
  0x84   :  { %v453_v49 = vsel %vm451_vm7, %v452_v31, %v450_v43  ;;  %v2751_v21 = vpack.c.bf16 %v126_v15, %v120_v14  ;;  %v2801_v31 = vpack.c.bf16 %v791_v29, %v790_v28  ;;  %v2807_v42 = vpack.c.bf16 %v777_v39, %v776_v38  ;;  %v756_v38 = vld [vmem:[#allocation5 + $0xc0] sm:$0xff]  ;;  %v757_v39 = vld [vmem:[#allocation5 + $0xc8] sm:$0xff] }
  0x85   :  { %v534_v52 = vsel %vm529_vm1, %v460_v44, %v453_v49  ;;  %v2809_v43 = vpack.c.bf16 %v795_v41, %v794_v40  ;;  %v778_v44 = vld [vmem:[#allocation5 + $0x170] sm:$0xff]  ;;  %v780_v49 = vld [vmem:[#allocation5 + $0x180] sm:$0xff]  ;;  %v144_v25 = vlaneseq  ;;  %v2765_v41 = vpack.c.bf16 %v757_v39, %v756_v38  ;;  %v771_v38 = vld [vmem:[#allocation5 + $0x138] sm:$0xff] }
  0x86   :  { %535 = vrot.lane.b32.xlu0 %v534_v52, %s3134_s11  ;;  %2752 = vmatprep.subr.bf16.mxu0 %v2751_v21  ;;  %v2811_v48 = vpack.c.bf16 %v779_v45, %v778_v44  ;;  %v799_v52 = vld [vmem:[#allocation5 + $0x218] sm:$0xff]  ;;  %v2815_v54 = vpack.c.bf16 %v781_v50, %v780_v49  ;;  %v660_v40 = vld [vmem:[#allocation5 + $0x30] sm:$0xff]  ;;  %v740_v49 = vld [vmem:[#allocation5 + $0x40] sm:$0xff]  ;;  %vm1292_vm1 = vcmask 9216   ;;  %vm1694_vm5 = vcmask 1045504   ;;  %s2309_s11 = sshll.u32 %s3142_s4, 4  ;;  %s2310_s11 = int_to_ptr.vmem [resolvable:$true] %s2309_s11 }
  0x87   :  { %2754 = vmatpush1.bf16.msra.mxu0 %v2753_v22  ;;  %v741_v50 = vld [vmem:[#allocation5 + $0x48] sm:$0xff]  ;;  %vm1829_vm6 = vcmask 15360   ;;  %s3069_s12 = scalar_lea.vmem %s2310_s11, 32  ;;  %p3074_p5 = scmp.lt.s32.totalorder %s2310_s11, %s2310_s11 }
  0x88   :  { %2756 = vmatprep.subr.bf16.mxu0 %v2755_v23  ;;  %v2763_v23 = vpack.c.bf16 %v659_v18, %v658_v17  ;;  %v2767_v57 = vpack.c.bf16 %v741_v50, %v740_v49  ;;  %v747_v17 = vld [vmem:[#allocation5 + $0x78] sm:$0xff]  ;;  %v764_v18 = vld [vmem:[#allocation5 + $0x100] sm:$0xff]  ;;  %v821_v49 = vld [vmem:[#allocation5 + $0x2c8] sm:$0xff]  ;;  %p3070_p4 = scmp.ne.s32.totalorder %s2310_s11, %s3069_s12  ;;  %p3075_p6 = scmp.lt.s32.totalorder %s3069_s12, %s3069_s12 }
  0x8a   :  { %563 = vrot.lane.b32.xlu0 %v562_v55, %s3139_s0  ;;  %v2817_v55 = vpack.c.bf16 %v799_v52, %v798_v51  ;;  %v758_v52 = vld [vmem:[#allocation5 + $0xd0] sm:$0xff]  ;;  %p3076_p7 = por %p3075_p6, %p3074_p5 }
  0x8b   :  { %2758 = vmatpush1.bf16.msra.mxu0 %v2757_v4  ;;  %v3346_v4 = vshrl.u32 %v144_v25, 7 }
  0x8c   :  { %2798 = vmatprep.subr.bf16.mxu0 %v2797_v3  ;;  %v140_v3 = vld [vmem:[#allocation2 + $0x180] ss:$8 sm:$0xf]  ;;  %p3077_p8 = pnand %p3076_p7, %p3070_p4 }
  0x8d   :  { %v3348_v27 = vor.u32 %v141_v26, %v140_v3  ;;  %v154_v28 = vsub.s32 2, %v3346_v4  ;;  %v158_v29 = vsub.s32 3, %v3346_v4  ;;  %v750_v3 = vld [vmem:[#allocation5 + $0x90] sm:$0xff]  ;;  %v751_v26 = vld [vmem:[#allocation5 + $0x98] sm:$0xff] }
  0x8e   :  { %2326 = vmatmul.mubr.msk.f32.vlgmr.msra.gmra.mrb[2].mxu0 %vm174_vm2, %v3313_v8  ;;  %v2813_v8 = vpack.c.bf16 %v797_v47, %v796_v46  ;;  %v150_v46 = vsub.s32 1, %v3346_v4 }
  0x8f   :  { %2800 = vmatpush3.bf16.msra.mxu0 %v2799_v30  ;;  %v155_v30 = vrot.slane %v3348_v27, %v154_v28 }
  0x90   :  { %2802 = vmatprep.subr.bf16.mxu0 %v2801_v31  ;;  %v159_v31 = vrot.slane %v3348_v27, %v158_v29  ;;  %v151_v47 = vrot.slane %v3348_v27, %v150_v46  ;;  %v768_v29 = vld [vmem:[#allocation5 + $0x120] sm:$0xff] }
  0x93   :  { %2804 = vmatpush3.bf16.msra.mxu0 %v2803_v36 }
  0x94   :  { %2806 = vmatprep.subr.bf16.mxu0 %v2805_v37 }
  0x97   :  { %2808 = vmatpush3.bf16.msra.mxu0 %v2807_v42 }
  0x98   :  { %2810 = vmatprep.subr.bf16.mxu0 %v2809_v43 }
  0x9b   :  { %2812 = vmatpush3.bf16.msra.mxu0 %v2811_v48  ;;  %v2327_v48 = vld [vmem:[#allocation5 + $0x18] ss:$0 sm:$0xff] }
  0x9c   :  { %2814 = vmatprep.subr.bf16.mxu0 %v2813_v8 }
  0x9f   :  { %2816 = vmatpush3.bf16.msra.mxu0 %v2815_v54  ;;  %v759_v54 = vld [vmem:[#allocation5 + $0xd8] sm:$0xff] }
  0xa0   :  { %2818 = vmatprep.subr.bf16.mxu0 %v2817_v55 }
  0xa3   :  { %2820 = vmatpush3.bf16.msra.mxu0 %v2819_v60  ;;  %v2769_v60 = vpack.c.bf16 %v759_v54, %v758_v52 }
  0xa4   :  { %2822 = vmatprep.subr.bf16.mxu0 %v2821_v61  ;;  %v742_v61 = vld [vmem:[#allocation5 + $0x50] sm:$0xff] }
  0xa5   :  { %v2771_v7 = vpack.c.bf16 %v743_v62, %v742_v61 }
  0xa7   :  { %2824 = vmatpush3.bf16.msra.mxu0 %v2823_v5  ;;  %v761_v5 = vld [vmem:[#allocation5 + $0xe8] sm:$0xff] }
  0xa8   :  { %2826 = vmatprep.subr.bf16.mxu0 %v2825_v10  ;;  %v2773_v6 = vpack.c.bf16 %v761_v5, %v760_v63  ;;  %v745_v10 = vld [vmem:[#allocation5 + $0x68] sm:$0xff]  ;;  %v806_v63 = vld [vmem:[#allocation5 + $0x250] sm:$0xff]  ;;  %v807_v5 = vld [vmem:[#allocation5 + $0x258] sm:$0xff] }
  0xab   :  { %2828 = vmatpush3.bf16.msra.mxu0 %v2827_v12  ;;  %v763_v12 = vld [vmem:[#allocation5 + $0xf8] sm:$0xff] }
  0xac   :  { %2861 = vmatprep.subr.bf16.mxu0 %v3137_v13 }
  0xd2   :  { %v542_v14 = vpop.permute.xlu0 %541 }
  0xd4   :  { %v548_v15 = vpop.permute.xlu1 %547 }
  0xd8   :  { %v556_v20 = vpop.permute.xlu1 %555 }
  0xf8   :  { %v536_v16 = vpop.permute.xlu0 %535 }
  0xf9   :  { %v566_v19 = vsel %vm397_vm0, %v3306_v53, %v536_v16  ;;  %v746_v16 = vld [vmem:[#allocation5 + $0x70] sm:$0xff] }
  0xfa   :  { %v568_v21 = vsel %vm567_vm8, %v566_v19, %v542_v14  ;;  %v2775_v14 = vpack.c.bf16 %v745_v10, %v744_v9  ;;  %v765_v19 = vld [vmem:[#allocation5 + $0x108] sm:$0xff]  ;;  %v808_v9 = vld [vmem:[#allocation5 + $0x260] sm:$0xff] }
  0xfb   :  { %v570_v22 = vsel %vm569_vm9, %v568_v21, %v548_v15  ;;  %v2777_v15 = vpack.c.bf16 %v763_v12, %v762_v11  ;;  %v2781_v21 = vpack.c.bf16 %v765_v19, %v764_v18  ;;  %v809_v10 = vld [vmem:[#allocation5 + $0x268] sm:$0xff]  ;;  %v826_v11 = vld [vmem:[#allocation5 + $0x2f0] sm:$0xff]  ;;  %v827_v12 = vld [vmem:[#allocation5 + $0x2f8] sm:$0xff] }
  0xfc   :  { %v572_v2 = vsel %vm571_vm10, %v570_v22, %v556_v20  ;;  %v564_v1 = vpop.permute.xlu0 %563  ;;  %v2779_v20 = vpack.c.bf16 %v747_v17, %v746_v16  ;;  %v748_v22 = vld [vmem:[#allocation5 + $0x80] sm:$0xff]  ;;  %v810_v16 = vld [vmem:[#allocation5 + $0x270] sm:$0xff]  ;;  %v811_v17 = vld [vmem:[#allocation5 + $0x278] sm:$0xff] }
  0xfd   :  { %v574_v24 = vsel %vm573_vm11, %v572_v2, %v564_v1  ;;  %v766_v2 = vld [vmem:[#allocation5 + $0x110] sm:$0xff]  ;;  %v767_v1 = vld [vmem:[#allocation5 + $0x118] sm:$0xff]  ;;  %v828_v18 = vld [vmem:[#allocation5 + $0x300] sm:$0xff] }
  0xfe   :  { %2593 = vmatmul.mubr.msk.f32.vlgmr.msra.gmra.mrb[2].mxu1 %vm583_vm12, %v574_v24  ;;  %v2785_v25 = vpack.c.bf16 %v767_v1, %v766_v2  ;;  %v829_v19 = vld [vmem:[#allocation5 + $0x308] sm:$0xff]  ;;  %v830_v2 = vld [vmem:[#allocation5 + $0x310] sm:$0xff]  ;;  %v831_v1 = vld [vmem:[#allocation5 + $0x318] sm:$0xff] }
  0xff   :  { %2764 = vmatpush3.bf16.msra.mxu1 %v2763_v23  ;;  %2601 = vmatprep.mubr.msk.f32.mxu1 %vm3138_vm3, %v3135_v0  ;;  %v749_v23 = vld [vmem:[#allocation5 + $0x88] sm:$0xff] }
 0x100   :  { %2599 = vmatprep.subr.mxu1 %v3135_v0  ;;  %v2783_v24 = vpack.c.bf16 %v749_v23, %v748_v22  ;;  %v812_v22 = vld [vmem:[#allocation5 + $0x280] sm:$0xff]  ;;  %v813_v23 = vld [vmem:[#allocation5 + $0x288] sm:$0xff] }
 0x103   :  { %2600 = vmatpush3.msra.mxu1 %v660_v40 }
 0x104   :  { %2766 = vmatprep.subr.bf16.mxu1 %v2765_v41 }
 0x141   :  { %v315_v32 = vpop.f32.mrb[0].mxu1 }
 0x142   :  { %v316_v33 = vadd.f32 %v315_v32, %v155_v30  ;;  %v317_v34 = vpop.f32.mrb[1].mxu1  ;;  %v769_v30 = vld [vmem:[#allocation5 + $0x128] sm:$0xff]  ;;  %v2787_v32 = vpack.c.bf16 %v751_v26, %v750_v3  ;;  %v814_v3 = vld [vmem:[#allocation5 + $0x290] sm:$0xff]  ;;  %v815_v26 = vld [vmem:[#allocation5 + $0x298] sm:$0xff] }
 0x143   :  { %v318_v35 = vadd.f32 %v317_v34, %v159_v31  ;;  %v146_v31 = vsub.s32 0, %v3346_v4  ;;  %v2789_v34 = vpack.c.bf16 %v769_v30, %v768_v29  ;;  %v832_v29 = vld [vmem:[#allocation5 + $0x320] sm:$0xff]  ;;  %v833_v30 = vld [vmem:[#allocation5 + $0x328] sm:$0xff] }
 0x144   :  { %v393_v36 = vmax.f32 %v316_v33, 0.0  ;;  %v166_v33 = vsub.s32 5, %v3346_v4 }
 0x145   :  { %v394_v37 = vmax.f32 %v318_v35, 0.0  ;;  %v752_v35 = vld [vmem:[#allocation5 + $0xa0] sm:$0xff]  ;;  %v147_v39 = vrot.slane %v3348_v27, %v146_v31 }
 0x146   :  { %v167_v41 = vrot.slane %v3348_v27, %v166_v33  ;;  %v2851_v33 = vpack.c.bf16 %v815_v26, %v814_v3 }
 0x147   :  { %980 = vmatprep.mubr.f32.mxu0 %v394_v37  ;;  %v770_v37 = vld [vmem:[#allocation5 + $0x130] sm:$0xff] }
 0x148   :  { %981 = vmatmul.mubr.f32.vlgmr.msra.gmra.mrb[4].mxu0 %v393_v36  ;;  %v753_v36 = vld [vmem:[#allocation5 + $0xa8] sm:$0xff] }
 0x149   :  { %2608 = vmatprep.mubr.msk.f32.mxu0 %vm3138_vm3, %v3135_v0  ;;  %v2791_v40 = vpack.c.bf16 %v753_v36, %v752_v35  ;;  %v816_v35 = vld [vmem:[#allocation5 + $0x2a0] sm:$0xff]  ;;  %v817_v36 = vld [vmem:[#allocation5 + $0x2a8] sm:$0xff] }
 0x14e   :  { %v3358_v42 = vpop.f32.mrb[0].mxu0 }
 0x14f   :  { %v246_v43 = vpop.f32.mrb[1].mxu0  ;;  %v245_v50 = vadd.f32 %v3358_v42, %v147_v39  ;;  %v825_v42 = vld [vmem:[#allocation5 + $0x2e8] sm:$0xff] }
 0x150   :  { %v247_v8 = vadd.f32 %v246_v43, %v151_v47  ;;  %v2793_v43 = vpack.c.bf16 %v771_v38, %v770_v37  ;;  %v754_v47 = vld [vmem:[#allocation5 + $0xb0] sm:$0xff]  ;;  %v835_v38 = vld [vmem:[#allocation5 + $0x338] sm:$0xff] }
 0x151   :  { %v834_v37 = vld [vmem:[#allocation5 + $0x330] sm:$0xff] }
 0x152   :  { %v392_v58 = vmax.f32 %v247_v8, 0.0  ;;  %v820_v8 = vld [vmem:[#allocation5 + $0x2c0] sm:$0xff] }
 0x153   :  { %v2829_v54 = vpack.c.bf16 %v821_v49, %v820_v8 }
 0x161   :  { %v3360_v44 = vpop.f32.mrb[2].mxu0 }
 0x162   :  { %v3362_v45 = vpop.f32.mrb[3].mxu0 }
 0x163   :  { %v389_v52 = vadd.f32 %v3362_v45, %v167_v41  ;;  %v2857_v41 = vpack.c.bf16 %v835_v38, %v834_v37  ;;  %v2897_v38 = vld [vmem:[#allocation7] ss:$12 sps:$4 sm:$0xff]  }
 0x165   :  { %v396_v61 = vmax.f32 %v389_v52, 0.0  ;;  %v836_v52 = vld [vmem:[#allocation5 + $0x340] sm:$0xff] }
 0x1d1   :  { %v653_v51 = vpop.f32.mrb[2].mxu1 }
 0x1d2   :  { %v654_v55 = vadd.f32 %v2327_v48, %v653_v51  ;;  %v2594_v56 = vpop.f32.mrb[3].mxu1  ;;  %v755_v48 = vld [vmem:[#allocation5 + $0xb8] sm:$0xff] }
 0x1d3   :  { %v2795_v51 = vpack.c.bf16 %v755_v48, %v754_v47  ;;  %v805_v56 = vld [vmem:[#allocation5 + $0x248] sm:$0xff]  ;;  %v819_v47 = vld [vmem:[#allocation5 + $0x2b8] sm:$0xff] }
 0x1d4   :  { %v657_v59 = vmax.f32 %v654_v55, 0.0  ;;  %v804_v55 = vld [vmem:[#allocation5 + $0x240] sm:$0xff] }
 0x1d6   :  { %2602 = vmatmul.mubr.msk.f32.vlgmr.msra.gmra.mrb[4].mxu1 %vm583_vm12, %v657_v59  ;;  %v391_v59 = vmax.f32 %v245_v50, 0.0 }
 0x1d7   :  { %2768 = vmatpush3.bf16.msra.mxu1 %v2767_v57  ;;  %910 = vmatprep.mubr.f32.mxu1 %v392_v58  ;;  %v822_v57 = vld [vmem:[#allocation5 + $0x2d0] sm:$0xff]  ;;  %v823_v58 = vld [vmem:[#allocation5 + $0x2d8] sm:$0xff] }
 0x1d8   :  { %2770 = vmatprep.subr.bf16.mxu1 %v2769_v60  ;;  %v2831_v60 = vpack.c.bf16 %v805_v56, %v804_v55  ;;  %v2833_v62 = vpack.c.bf16 %v823_v58, %v822_v57  ;;  %v1127_v56 = vld [vmem:[#allocation5 + $0x358] sm:$0xff]  ;;  %v1128_v57 = vld [vmem:[#allocation5 + $0x360] sm:$0xff] }
 0x1db   :  { %2772 = vmatpush3.bf16.msra.mxu1 %v2771_v7  ;;  %v824_v7 = vld [vmem:[#allocation5 + $0x2e0] sm:$0xff] }
 0x1dc   :  { %2774 = vmatprep.subr.bf16.mxu1 %v2773_v6  ;;  %v2835_v6 = vpack.c.bf16 %v807_v5, %v806_v63  ;;  %v2837_v45 = vpack.c.bf16 %v825_v42, %v824_v7  ;;  %v2331_v5 = vld [vmem:[#allocation5 + $0x350] ss:$0 sm:$0xff] }
 0x1df   :  { %2776 = vmatpush3.bf16.msra.mxu1 %v2775_v14  ;;  %v2839_v14 = vpack.c.bf16 %v809_v10, %v808_v9 }
 0x1e0   :  { %2778 = vmatprep.subr.bf16.mxu1 %v2777_v15  ;;  %v2841_v15 = vpack.c.bf16 %v827_v12, %v826_v11 }
 0x1e3   :  { %2780 = vmatpush3.bf16.msra.mxu1 %v2779_v20  ;;  %v2843_v20 = vpack.c.bf16 %v811_v17, %v810_v16 }
 0x1e4   :  { %2782 = vmatprep.subr.bf16.mxu1 %v2781_v21  ;;  %v2845_v21 = vpack.c.bf16 %v829_v19, %v828_v18 }
 0x1e7   :  { %2784 = vmatpush3.bf16.msra.mxu1 %v2783_v24  ;;  %v2847_v24 = vpack.c.bf16 %v813_v23, %v812_v22  ;;  %v1212_v22 = vld [vmem:[#allocation5 + $0x388] sm:$0xff] }
 0x1e8   :  { %2786 = vmatprep.subr.bf16.mxu1 %v2785_v25  ;;  %v2849_v25 = vpack.c.bf16 %v831_v1, %v830_v2  ;;  %v2900_v2 = vld [vmem:[#allocation7 + $0x8] ss:$12 sps:$4 sm:$0xff]   ;;  %v2908_v1 = vld [vmem:[#allocation7 + $0x38] ss:$12 sps:$4 sm:$0xff]  }
 0x1eb   :  { %2788 = vmatpush3.bf16.msra.mxu1 %v2787_v32  ;;  %v162_v32 = vsub.s32 4, %v3346_v4 }
 0x1ec   :  { %2790 = vmatprep.subr.bf16.mxu1 %v2789_v34  ;;  %v2853_v34 = vpack.c.bf16 %v833_v30, %v832_v29 }
 0x1ed   :  { %v163_v39 = vrot.slane %v3348_v27, %v162_v32 }
 0x1ef   :  { %2792 = vmatpush3.bf16.msra.mxu1 %v2791_v40  ;;  %v2855_v40 = vpack.c.bf16 %v817_v36, %v816_v35  ;;  %v387_v48 = vadd.f32 %v3360_v44, %v163_v39  ;;  %v2329_v44 = vld [vmem:[#allocation5 + $0x38] ss:$0 sm:$0xff]  ;;  %v2899_v36 = vld [vmem:[#allocation7 + $0x4] ss:$12 sps:$4 sm:$0xff]   ;;  %v2903_v39 = vld [vmem:[#allocation7 + $0x1c] ss:$12 sps:$4 sm:$0xff]  }
 0x1f0   :  { %2794 = vmatprep.subr.bf16.mxu1 %v2793_v43  ;;  %v818_v43 = vld [vmem:[#allocation5 + $0x2b0] sm:$0xff]  ;;  %v1315_v35 = vld [vmem:[%s3515_s6] sm:$0xff] }
 0x1f1   :  { %v2859_v8 = vpack.c.bf16 %v819_v47, %v818_v43  ;;  %v395_v49 = vmax.f32 %v387_v48, 0.0  ;;  %v2911_v43 = vld [vmem:[#allocation7 + $0x4c] ss:$12 sps:$4 sm:$0xff]   ;;  %v2909_v47 = vld [vmem:[#allocation7 + $0x48] ss:$12 sps:$4 sm:$0xff]  }
 0x1f2   :  { %v2912_v48 = vld [vmem:[#allocation7 + $0x50] ss:$12 sps:$4 sm:$0xff]  }
 0x1f3   :  { %2796 = vmatpush3.bf16.msra.mxu1 %v2795_v51 }
 0x1f4   :  { %2830 = vmatprep.subr.bf16.mxu1 %v2829_v54  ;;  %v837_v54 = vld [vmem:[#allocation5 + $0x348] sm:$0xff] }
 0x1f5   :  { %v2862_v55 = vpack.c.bf16 %v837_v54, %v836_v52  ;;  %v2920_v52 = vld [vmem:[#allocation7 + $0x80] ss:$12 sps:$4 sm:$0xff]  }
 0x1f6   :  { %911 = vmatmul.mubr.f32.vlgmr.msra.gmra.mrb[6].mxu1 %v391_v59  ;;  %v2923_v54 = vld [vmem:[#allocation7 + $0x94] ss:$12 sps:$4 sm:$0xff]  }
 0x1f7   :  { %2832 = vmatpush3.bf16.msra.mxu1 %v2831_v60  ;;  %1050 = vmatprep.mubr.f32.mxu1 %v396_v61  ;;  %v2865_v61 = vpack.c.bf16 %v1128_v57, %v1127_v56  ;;  %v2927_v56 = vld [vmem:[#allocation7 + $0xac] ss:$12 sps:$4 sm:$0xff]   ;;  %v3140_v57 = vmov 0  }
 0x1f8   :  { %2834 = vmatprep.subr.bf16.mxu1 %v2833_v62  ;;  %2863 = vmatpush3.bf16.msra.mxu0 %v2862_v55  ;;  %v2921_v55 = vld [vmem:[#allocation7 + $0x90] ss:$12 sps:$4 sm:$0xff]  }
 0x1f9   :  { %2864 = vmatprep.subr.bf16.mxu0 %v3137_v13  ;;  %2894 = vset.pattern.permute.xlu0 %v3140_v57 }
 0x1fb   :  { %2836 = vmatpush3.bf16.msra.mxu1 %v2835_v6 }
 0x1fc   :  { %2838 = vmatprep.subr.bf16.mxu1 %v2837_v45 }
 0x1ff   :  { %2840 = vmatpush3.bf16.msra.mxu1 %v2839_v14  ;;  %v1129_v14 = vld [vmem:[#allocation5 + $0x368] sm:$0xff] }
 0x200   :  { %2842 = vmatprep.subr.bf16.mxu1 %v2841_v15  ;;  %v1130_v15 = vld [vmem:[#allocation5 + $0x370] sm:$0xff] }
 0x201   :  { %v2868_v16 = vpack.c.bf16 %v1130_v15, %v1129_v14 }
 0x203   :  { %2844 = vmatpush3.bf16.msra.mxu1 %v2843_v20 }
 0x204   :  { %2846 = vmatprep.subr.bf16.mxu1 %v2845_v21  ;;  %v1211_v21 = vld [vmem:[#allocation5 + $0x380] sm:$0xff] }
 0x205   :  { %v2871_v23 = vpack.c.bf16 %v1212_v22, %v1211_v21  ;;  %v2932_v21 = vld [vmem:[#allocation8 + $0xf8] sm:$0xff]   ;;  %v2933_v22 = vld [vmem:[#allocation8 + $0x100] sm:$0xff]  }
 0x207   :  { %2848 = vmatpush3.bf16.msra.mxu1 %v2847_v24  ;;  %v1307_v24 = vpop.permute.xlu1 %1306 }
 0x208   :  { %2850 = vmatprep.subr.bf16.mxu1 %v2849_v25  ;;  %v2333_v25 = vld [vmem:[#allocation5 + $0x378] ss:$0 sm:$0xff]  ;;  %v1309_v3 = vsel %vm397_vm0, 0.0, %v1307_v24 }
 0x209   :  { %v1311_v32 = vrot.slane %v1309_v3, 6 }
 0x20b   :  { %2852 = vmatpush3.bf16.msra.mxu1 %v2851_v33  ;;  %v1305_v33 = vsel %vm397_vm0, %v3306_v53, 0.0  ;;  %v2901_v53 = vld [vmem:[#allocation7 + $0x18] ss:$12 sps:$4 sm:$0xff]   ;;  %vm1325_vm0 = vcmask 1042432  }
 0x20c   :  { %2854 = vmatprep.subr.bf16.mxu1 %v2853_v34  ;;  %v1314_v37 = vsel %vm1313_vm14, %v1305_v33, %v1311_v32 }
 0x20f   :  { %2856 = vmatpush3.bf16.msra.mxu1 %v2855_v40  ;;  %v2907_v40 = vld [vmem:[#allocation7 + $0x34] ss:$12 sps:$4 sm:$0xff]  }
 0x210   :  { %2858 = vmatprep.subr.bf16.mxu1 %v2857_v41  ;;  %v2905_v41 = vld [vmem:[#allocation7 + $0x30] ss:$12 sps:$4 sm:$0xff]  }
 0x213   :  { %2860 = vmatpush3.bf16.msra.mxu1 %v2859_v8  ;;  %v2915_v8 = vld [vmem:[#allocation7 + $0x64] ss:$12 sps:$4 sm:$0xff]  }
 0x214   :  { %2634 = vmatprep.subr.bf16.mxu1 %v3135_v0 }
 0x216   :  { %1051 = vmatmul.mubr.f32.vlgmr.msra.gmra.mrb[8].mxu1 %v395_v49  ;;  %v2913_v49 = vld [vmem:[#allocation7 + $0x60] ss:$12 sps:$4 sm:$0xff]  }
 0x217   :  { %2650 = vmatprep.mubr.msk.bf16.mxu1 %vm3138_vm3, %v3135_v0  ;;  %2635 = vmatpush3.bf16.msra.mxu1 %v2900_v2  ;;  %v2935_v2 = vld [vmem:[#allocation8 + $0x110] sm:$0xff]  }
 0x218   :  { %2636 = vmatprep.subr.bf16.mxu1 %v3135_v0 }
 0x21b   :  { %v2479_v27 = vpop.f32.mrb[4].mxu0 }
 0x21c   :  { %v2480_v50 = vpop.f32.mrb[5].mxu0 }
 0x21d   :  { %v2481_v51 = vadd.f32 %v2480_v50, %v2479_v27  ;;  %v2916_v27 = vld [vmem:[#allocation7 + $0x68] ss:$12 sps:$4 sm:$0xff]   ;;  %v2917_v50 = vld [vmem:[#allocation7 + $0x78] ss:$12 sps:$4 sm:$0xff]  }
 0x2a9   :  { %v735_v58 = vpop.f32.mrb[4].mxu1 }
 0x2aa   :  { %v736_v59 = vadd.f32 %v2329_v44, %v735_v58  ;;  %v2603_v60 = vpop.f32.mrb[5].mxu1  ;;  %v2924_v44 = vld [vmem:[#allocation7 + $0x98] ss:$12 sps:$4 sm:$0xff]   ;;  %v2925_v58 = vld [vmem:[#allocation7 + $0xa8] ss:$12 sps:$4 sm:$0xff]  }
 0x2ab   :  { %v1316_v60 = vld [vmem:[%s3515_s6 + $0x8] sm:$0x3] }
 0x2ac   :  { %v739_v62 = vmax.f32 %v736_v59, 0.0  ;;  %v2928_v59 = vld [vmem:[#allocation7 + $0xb0] ss:$12 sps:$4 sm:$0xff]  }
 0x2ae   :  { %2609 = vmatmul.mubr.msk.f32.vlgmr.msra.gmra.mrb[6].mxu0 %vm571_vm10, %v739_v62 }
 0x2af   :  { %2866 = vmatpush3.bf16.msra.mxu0 %v2865_v61  ;;  %2619 = vmatprep.mubr.msk.f32.mxu0 %vm3138_vm3, %v3135_v0  ;;  %v1318_v61 = vrot.slane %v1316_v60, 7 }
 0x2b0   :  { %2867 = vmatprep.subr.bf16.mxu0 %v3137_v13 }
 0x2b1   :  { %v1323_v62 = vsel %vm1322_vm15, %v1316_v60, %v1318_v61 }
 0x2b3   :  { %2869 = vmatpush3.bf16.msra.mxu0 %v2868_v16 }
 0x2b4   :  { %2870 = vmatprep.subr.bf16.mxu0 %v3137_v13  ;;  %v2904_v13 = vld [vmem:[#allocation7 + $0x20] ss:$12 sps:$4 sm:$0xff]  }
 0x2b5   :  { %2637 = vmatpush3.bf16.msra.mxu1 %v2904_v13  ;;  %v2936_v13 = vld [vmem:[#allocation8 + $0x118] sm:$0xff]  }
 0x2b6   :  { %2638 = vmatprep.subr.bf16.mxu1 %v3135_v0 }
 0x2b9   :  { %2639 = vmatpush3.bf16.msra.mxu1 %v2908_v1 }
 0x2ba   :  { %2640 = vmatprep.subr.bf16.mxu1 %v3135_v0 }
 0x2bd   :  { %2641 = vmatpush3.bf16.msra.mxu1 %v2912_v48 }
 0x2be   :  { %2642 = vmatprep.subr.bf16.mxu1 %v3135_v0 }
 0x2c1   :  { %2643 = vmatpush3.bf16.msra.mxu1 %v2916_v27 }
 0x2c2   :  { %2644 = vmatprep.subr.bf16.mxu1 %v3135_v0 }
 0x2c5   :  { %2645 = vmatpush3.bf16.msra.mxu1 %v2920_v52 }
 0x2c6   :  { %2646 = vmatprep.subr.bf16.mxu1 %v3135_v0 }
 0x2c9   :  { %v2444_v63 = vpop.f32.mrb[6].mxu1  ;;  %2647 = vmatpush3.bf16.msra.mxu1 %v2924_v44 }
 0x2ca   :  { %v2445_v7 = vpop.f32.mrb[7].mxu1  ;;  %2648 = vmatprep.subr.bf16.mxu1 %v3135_v0 }
 0x2cb   :  { %v2446_v42 = vadd.f32 %v2445_v7, %v2444_v63  ;;  %v2335_v63 = vld [vmem:[#allocation5 + $0x390] ss:$0 sm:$0xff]  ;;  %v1324_v7 = vsel %vm1313_vm14, %v1323_v62, %v1318_v61 }
 0x2cd   :  { %v913_v6 = vadd.f32 %v2446_v42, %v2331_v5  ;;  %2649 = vmatpush3.bf16.msra.mxu1 %v2928_v59  ;;  %v1320_v5 = vrot.slane %v1316_v60, 6 }
 0x2ce   :  { %2674 = vmatprep.subr.mxu1 %v3135_v0 }
 0x2cf   :  { %v983_v45 = vadd.f32 %v2481_v51, %v913_v6  ;;  %v2919_v51 = vld [vmem:[#allocation7 + $0x7c] ss:$12 sps:$4 sm:$0xff]  }
 0x2e9   :  { %v2514_v9 = vpop.f32.mrb[8].mxu1 }
 0x2ea   :  { %v2515_v10 = vpop.f32.mrb[9].mxu1 }
 0x2eb   :  { %v2516_v11 = vadd.f32 %v2515_v10, %v2514_v9  ;;  %v1326_v9 = vsel %vm1325_vm0, %v1324_v7, %v1320_v5 }
 0x2ed   :  { %v1053_v12 = vadd.f32 %v2516_v11, %v983_v45 }
 0x381   :  { %v1122_v17 = vpop.f32.mrb[6].mxu0 }
 0x382   :  { %v1123_v18 = vadd.f32 %v1122_v17, %v1053_v12  ;;  %v2610_v19 = vpop.f32.mrb[7].mxu0 }
 0x383   :  { %v2930_v19 = vld [vmem:[#allocation8 + $0xe8] sm:$0xff]  }
 0x384   :  { %v1126_v20 = vmax.f32 %v1123_v18, 0.0  ;;  %v2929_v18 = vld [vmem:[#allocation8 + $0xe0] sm:$0xff]  }
 0x386   :  { %2620 = vmatmul.mubr.msk.f32.vlgmr.msra.gmra.mrb[8].mxu0 %vm1136_vm13, %v1126_v20  ;;  %v2931_v20 = vld [vmem:[#allocation8 + $0xf0] sm:$0xff]  }
 0x387   :  { %2626 = vmatprep.mubr.msk.f32.mxu0 %vm3138_vm3, %v3135_v0  ;;  %2872 = vmatpush3.bf16.msra.mxu0 %v2871_v23  ;;  %v2934_v23 = vld [vmem:[#allocation8 + $0x108] sm:$0xff]  }
 0x388   :  { %2629 = vmatprep.subr.mxu0 %v3135_v0 }
 0x459   :  { %v1206_v26 = vpop.f32.mrb[8].mxu0 }
 0x45a   :  { %v1207_v29 = vadd.f32 %v2333_v25, %v1206_v26  ;;  %v2621_v30 = vpop.f32.mrb[9].mxu0 }
 0x45b   :  { %v1416_v30 = vld [vmem:[%s3515_s6 + $0x10] sm:$0x7] }
 0x45c   :  { %v1210_v34 = vmax.f32 %v1207_v29, 0.0  ;;  %v3141_v29 = vmov 1   ;;  %v1662_v32 = vrot.slane %v1416_v30, %v146_v31  ;;  %v1672_v33 = vrot.slane %v1416_v30, %v154_v28 }
 0x45d   :  { %2895 = vset.pattern.permute.xlu1 %v3141_v29 }
 0x45e   :  { %2627 = vmatmul.mubr.msk.f32.vlgmr.msra.gmra.mrb[10].mxu0 %vm571_vm10, %v1210_v34  ;;  %v1667_v34 = vrot.slane %v1416_v30, %v150_v46  ;;  %v2945_v30 = vld [vmem:[#allocation8 + $0x80] sm:$0xff]  }
 0x45f   :  { %2630 = vmatpush3.msra.mxu0 %v1315_v35  ;;  %2631 = vmatprep.mubr.msk.f32.mxu0 %vm3138_vm3, %v3135_v0 }
 0x460   :  { %1578 = vmatprep.subr.bf16.mxu0 %v2899_v36 }
 0x462   :  { %2632 = vmatmul.mubr.msk.f32.vlgmr.msra.gmra.mrb[12].mxu0 %vm567_vm8, %v1314_v37 }
 0x463   :  { %1579 = vmatpush1.bf16.msra.mxu0 %v2897_v38  ;;  %1610 = vmatprep.mubr.bf16.mxu0 %v3140_v57 }
 0x464   :  { %1580 = vmatprep.subr.bf16.mxu0 %v2903_v39 }
 0x467   :  { %1581 = vmatpush1.bf16.msra.mxu0 %v2901_v53 }
 0x468   :  { %1582 = vmatprep.subr.bf16.mxu0 %v2907_v40 }
 0x46b   :  { %1583 = vmatpush1.bf16.msra.mxu0 %v2905_v41 }
 0x46c   :  { %1584 = vmatprep.subr.bf16.mxu0 %v2911_v43 }
 0x46f   :  { %1585 = vmatpush1.bf16.msra.mxu0 %v2909_v47 }
 0x470   :  { %1586 = vmatprep.subr.bf16.mxu0 %v2915_v8 }
 0x473   :  { %1587 = vmatpush1.bf16.msra.mxu0 %v2913_v49 }
 0x474   :  { %1588 = vmatprep.subr.bf16.mxu0 %v2919_v51 }
 0x477   :  { %1589 = vmatpush1.bf16.msra.mxu0 %v2917_v50 }
 0x478   :  { %1590 = vmatprep.subr.bf16.mxu0 %v2923_v54 }
 0x47b   :  { %1591 = vmatpush1.bf16.msra.mxu0 %v2921_v55 }
 0x47c   :  { %1592 = vmatprep.subr.bf16.mxu0 %v2927_v56 }
 0x47f   :  { %1593 = vmatpush1.bf16.msra.mxu0 %v2925_v58  ;;  %v1828_v58 = vld [vmem:[%s3515_s6 + $0x30] sm:$0x3] }
 0x480   :  { %2654 = vmatprep.subr.bf16.mxu0 %v3135_v0 }
 0x531   :  { %v1287_v42 = vpop.f32.mrb[10].mxu0 }
 0x532   :  { %v1288_v6 = vadd.f32 %v2335_v63, %v1287_v42  ;;  %v2628_v45 = vpop.f32.mrb[11].mxu0 }
 0x534   :  { %v1291_v10 = vmul.f32 0.5, %v1288_v6 }
 0x535   :  { %v1396_v11 = vpop.f32.mrb[12].mxu0 }
 0x536   :  { %v1397_v12 = vadd.f32 %v1396_v11, %v1326_v9  ;;  %v2633_v14 = vpop.f32.mrb[13].mxu0  ;;  %v1293_v15 = vsel %vm1292_vm1, %v1291_v10, -inf }
 0x537   :  { %1294 = vmax.xlane.f32.xlu0 %v1293_v15 }
 0x538   :  { %2969 = vtanh.f32 %v1397_v12 }
 0x542   :  { %v3417_v16 = vpop.eup %2969 }
 0x543   :  { %v1417_v17 = vpack.c.bf16 %v3417_v16, %v3417_v16 }
 0x545   :  { %1611 = vmatmul.mubr.bf16.vlgmr.msra.gmra.mrb[16].mxu0 %v1417_v17  ;;  %2651 = vmatmul.mubr.bf16.vlgmr.msra.gmra.mrb[12].mxu1 %v1417_v17 }
 0x546   :  { %2670 = vmatprep.mubr.msk.bf16.mxu0 %vm3138_vm3, %v3135_v0  ;;  %2676 = vmatprep.mubr.msk.f32.mxu1 %vm3138_vm3, %v3135_v0 }
 0x547   :  { %2655 = vmatpush3.bf16.msra.mxu0 %v2929_v18  ;;  %2675 = vmatpush3.msk.msra.mxu1 %vm1313_vm14, %v1828_v58  ;;  %v2961_v58 = vld [vmem:[#allocation8 + $0xc0] sm:$0xff]  }
 0x548   :  { %2656 = vmatprep.subr.bf16.mxu0 %v3135_v0  ;;  %2679 = vmatprep.subr.bf16.mxu1 %v3135_v0 }
 0x54b   :  { %2657 = vmatpush3.bf16.msra.mxu0 %v2930_v19 }
 0x54c   :  { %2658 = vmatprep.subr.bf16.mxu0 %v3135_v0 }
 0x54f   :  { %2659 = vmatpush3.bf16.msra.mxu0 %v2931_v20 }
 0x550   :  { %2660 = vmatprep.subr.bf16.mxu0 %v3135_v0 }
 0x553   :  { %2661 = vmatpush3.bf16.msra.mxu0 %v2932_v21 }
 0x554   :  { %2662 = vmatprep.subr.bf16.mxu0 %v3135_v0 }
 0x557   :  { %2663 = vmatpush3.bf16.msra.mxu0 %v2933_v22  ;;  %v2937_v22 = vld [vmem:[#allocation8] sm:$0xff]  }
 0x558   :  { %2664 = vmatprep.subr.bf16.mxu0 %v3135_v0 }
 0x55b   :  { %2665 = vmatpush3.bf16.msra.mxu0 %v2934_v23 }
 0x55c   :  { %2666 = vmatprep.subr.bf16.mxu0 %v3135_v0 }
 0x55f   :  { %2667 = vmatpush3.bf16.msra.mxu0 %v2935_v2 }
 0x560   :  { %2668 = vmatprep.subr.bf16.mxu0 %v3135_v0 }
 0x563   :  { %2669 = vmatpush3.bf16.msra.mxu0 %v2936_v13  ;;  %v2938_v13 = vld [vmem:[#allocation8 + $0x8] sm:$0xff]  }
 0x564   :  { %2559 = vmatprep.subr.bf16.mxu0 %v2945_v30 }
 0x5c4   :  { %v1295_v1 = vpop.xlane.xlu0 %1294 }
 0x5c5   :  { %v1296_v24 = vsub.f32 %v1291_v10, %v1295_v1  ;;  %v2939_v1 = vld [vmem:[#allocation8 + $0x10] sm:$0xff]  }
 0x5c7   :  { %v1297_v25 = vmul.f32 1.442695, %v1296_v24  ;;  %v2940_v24 = vld [vmem:[#allocation8 + $0x18] sm:$0xff]  }
 0x5c9   :  { %2971 = vpow2.f32 %v1297_v25  ;;  %v2941_v25 = vld [vmem:[#allocation8 + $0x20] sm:$0xff]  }
 0x5d3   :  { %v2972_v3 = vpop.eup %2971 }
 0x5d4   :  { %v1299_v26 = vsel %vm1292_vm1, %v2972_v3, 0.0 }
 0x5d5   :  { %1300 = vadd.xlane.f32.xlu1 %v1299_v26  ;;  %v2943_v26 = vld [vmem:[#allocation8 + $0x30] sm:$0xff]  }
 0x618   :  { %v1612_v35 = vpop.f32.mrb[16].mxu0  ;;  %v1653_v36 = vpop.f32.mrb[12].mxu1 }
 0x619   :  { %v1663_v37 = vadd.f32 %v1662_v32, %v1612_v35  ;;  %v3442_v38 = vadd.f32 %v1672_v33, %v1653_v36  ;;  %v1614_v39 = vpop.f32.mrb[17].mxu0  ;;  %v2652_v53 = vpop.f32.mrb[13].mxu1  ;;  %v2946_v32 = vld [vmem:[#allocation8 + $0x40] sm:$0xff]   ;;  %v2947_v33 = vld [vmem:[#allocation8 + $0x88] sm:$0xff]   ;;  %v2949_v35 = vld [vmem:[#allocation8 + $0x90] sm:$0xff]  }
 0x61a   :  { %v1668_v40 = vadd.f32 %v1667_v34, %v1614_v39  ;;  %v1616_v41 = vpop.f32.mrb[18].mxu0  ;;  %v1656_v43 = vpop.f32.mrb[14].mxu1  ;;  %v2948_v34 = vld [vmem:[#allocation8 + $0x48] sm:$0xff]   ;;  %v2950_v36 = vld [vmem:[#allocation8 + $0x50] sm:$0xff]   ;;  %v2952_v39 = vld [vmem:[#allocation8 + $0x58] sm:$0xff]  }
 0x61b   :  { %v1617_v47 = vpop.f32.mrb[19].mxu0  ;;  %v2653_v48 = vpop.f32.mrb[15].mxu1  ;;  %v2953_v53 = vld [vmem:[#allocation8 + $0xa0] sm:$0xff]   ;;  %v2955_v41 = vld [vmem:[#allocation8 + $0xa8] sm:$0xff]  }
 0x61c   :  { %v1674_v8 = vmul.f32 %v1668_v40, %v1663_v37  ;;  %v1676_v31 = vrot.slane %v1668_v40, 2  ;;  %v1679_v49 = vrot.slane %v1668_v40, 6  ;;  %v2954_v40 = vld [vmem:[#allocation8 + $0x60] sm:$0xff]   ;;  %v2956_v43 = vld [vmem:[#allocation8 + $0x68] sm:$0xff]   ;;  %v2957_v47 = vld [vmem:[#allocation8 + $0xb0] sm:$0xff]  }
 0x61d   :  { %v2958_v48 = vld [vmem:[#allocation8 + $0x70] sm:$0xff]  }
 0x61e   :  { %v1678_v27 = vmul.f32 %v1676_v31, %v1663_v37  ;;  %v1681_v28 = vmul.f32 %v1679_v49, %v1663_v37  ;;  %v1689_v46 = vrot.slane %v1674_v8, 4  ;;  %v2951_v37 = vld [vmem:[#allocation8 + $0x98] sm:$0xff]  }
 0x620   :  { %v1683_v50 = vrot.slane %v1678_v27, 6  ;;  %v1686_v4 = vrot.slane %v1681_v28, 6 }
 0x622   :  { %v1691_v51 = vsel %vm1313_vm14, %v1674_v8, %v1683_v50  ;;  %v1912_v8 = vrot.slane %v3442_v38, 4 }
 0x623   :  { %v1693_v52 = vsel %vm1692_vm4, %v1691_v51, %v1686_v4 }
 0x624   :  { %v1695_v54 = vsel %vm1694_vm5, %v1693_v52, %v1689_v46 }
 0x625   :  { %v1696_v55 = vpack.c.bf16 %v1695_v54, %v1695_v54 }
 0x627   :  { %2671 = vmatmul.mubr.bf16.vlgmr.msra.gmra.mrb[20].mxu0 %v1696_v55 }
 0x628   :  { %2560 = vmatpush3.bf16.msra.mxu0 %v2946_v32 }
 0x629   :  { %2561 = vmatprep.subr.bf16.mxu0 %v2947_v33 }
 0x62c   :  { %2562 = vmatpush3.bf16.msra.mxu0 %v2948_v34 }
 0x62d   :  { %2563 = vmatprep.subr.bf16.mxu0 %v2949_v35 }
 0x630   :  { %2564 = vmatpush3.bf16.msra.mxu0 %v2950_v36 }
 0x631   :  { %2565 = vmatprep.subr.bf16.mxu0 %v2951_v37 }
 0x634   :  { %2566 = vmatpush3.bf16.msra.mxu0 %v2952_v39 }
 0x635   :  { %2567 = vmatprep.subr.bf16.mxu0 %v2953_v53 }
 0x638   :  { %2568 = vmatpush3.bf16.msra.mxu0 %v2954_v40 }
 0x639   :  { %2569 = vmatprep.subr.bf16.mxu0 %v2955_v41 }
 0x63c   :  { %2570 = vmatpush3.bf16.msra.mxu0 %v2956_v43 }
 0x63d   :  { %2571 = vmatprep.subr.bf16.mxu0 %v2957_v47 }
 0x640   :  { %2572 = vmatpush3.bf16.msra.mxu0 %v2958_v48 }
 0x662   :  { %v1301_v44 = vpop.xlane.xlu1 %1300 }
 0x663   :  { %2973 = vrcp.f32 %v1301_v44 }
 0x66d   :  { %v2974_v56 = vpop.eup %2973 }
 0x66e   :  { %v1303_v57 = vmul.f32 %v2974_v56, %v2972_v3  ;;  %v2942_v3 = vld [vmem:[#allocation8 + $0x28] sm:$0xff]   ;;  %v2959_v56 = vld [vmem:[#allocation8 + $0xb8] sm:$0xff]  }
 0x66f   :  { %2573 = vmatprep.subr.bf16.mxu0 %v2959_v56 }
 0x670   :  { %1408 = vperm.xlu1 %2895, %v1303_v57   ;;  %1304 = vst.msk [vmem:[#allocation11] sm:$0x3] %vm1292_vm1, %v1303_v57  ;;  %1403 = vperm.xlu0 %2894, %v1303_v57   ;;  %v2960_v57 = vld [vmem:[#allocation8 + $0x78] sm:$0xff]  }
 0x671   :  { %2574 = vmatpush3.bf16.msra.mxu0 %v2960_v57 }
 0x674   :  { %2896 = vset.pattern.permute.xlu0 %v3141_v29  ;;  %v2944_v29 = vld [vmem:[#allocation8 + $0x38] sm:$0xff]  }
 0x6fa   :  { %v1795_v59 = vpop.f32.mrb[20].mxu0 }
 0x6fb   :  { %v1801_v60 = vmul.f32 0.1490712, %v1795_v59  ;;  %v2672_v61 = vpop.f32.mrb[21].mxu0  ;;  %v1409_v59 = vpop.permute.xlu1 %1408 }
 0x6fc   :  { %v1798_v62 = vpop.f32.mrb[22].mxu0  ;;  %v1412_v61 = vrot.slane %v3417_v16, 2 }
 0x6fd   :  { %v1803_v63 = vrot.slane %v1801_v60, 2  ;;  %v2673_v5 = vpop.f32.mrb[23].mxu0 }
 0x6fe   :  { %v1414_v62 = vmul.f32 %v1412_v61, %v1409_v59  ;;  %v2372_v5 = vld [vmem:[%s3515_s6 + $0x18] ss:$0 sm:$0xff] }
 0x6ff   :  { %v1805_v7 = vmax.f32 %v1801_v60, %v1803_v63 }
 0x701   :  { %v1806_v42 = vsub.f32 %v1801_v60, %v1805_v7  ;;  %v1810_v6 = vrot.slane %v1805_v7, 6 }
 0x703   :  { %v1812_v45 = vsub.f32 %v1801_v60, %v1810_v6  ;;  %v1807_v9 = vmul.f32 1.442695, %v1806_v42  ;;  %v1404_v60 = vpop.permute.xlu0 %1403 }
 0x704   :  { %v1406_v63 = vmul.f32 %v3417_v16, %v1404_v60 }
 0x705   :  { %v1813_v10 = vmul.f32 1.442695, %v1812_v45 }
 0x706   :  { %v1415_v7 = vadd.f32 %v1414_v62, %v1406_v63 }
 0x707   :  { %2975 = vpow2.f32 %v1813_v10 }
 0x708   :  { %2977 = vpow2.f32 %v1807_v9 }
 0x711   :  { %v2976_v11 = vpop.eup %2975 }
 0x712   :  { %v1816_v12 = vrot.slane %v2976_v11, 2  ;;  %v2978_v14 = vpop.eup %2977 }
 0x714   :  { %v1818_v15 = vadd.f32 %v2978_v14, %v1816_v12  ;;  %v2034_v12 = vpack.c.bf16 %v1415_v7, %v1415_v7 }
 0x716   :  { %2979 = vrcp.f32 %v1818_v15  ;;  %v2964_v15 = vld [vmem:[#allocation8 + $0xd8] sm:$0xff]  }
 0x720   :  { %v2980_v17 = vpop.eup %2979 }
 0x721   :  { %v1822_v18 = vrot.slane %v2980_v17, 6  ;;  %v1820_v19 = vmul.f32 %v2980_v17, %v2978_v14  ;;  %v2963_v14 = vld [vmem:[#allocation8 + $0xd0] sm:$0xff]   ;;  %v2381_v17 = vld [vmem:[%s3515_s6 + $0x20] ss:$0 sm:$0xff] }
 0x723   :  { %v1824_v20 = vmul.f32 %v2976_v11, %v1822_v18 }
 0x725   :  { %v1825_v21 = vsel %vm1313_vm14, %v1820_v19, %v1824_v20 }
 0x726   :  { %v1826_v23 = vsel %vm1692_vm4, %v1825_v21, %v1820_v19 }
 0x727   :  { %v1827_v2 = vsel %vm1694_vm5, %v1826_v23, %v1824_v20 }
 0x728   :  { %2677 = vmatmul.mubr.msk.f32.vlgmr.msra.gmra.mrb[10].mxu1 %vm1829_vm6, %v1827_v2 }
 0x729   :  { %2680 = vmatpush3.bf16.msra.mxu1 %v2937_v22  ;;  %2695 = vmatprep.mubr.msk.bf16.mxu1 %vm3138_vm3, %v3135_v0 }
 0x72a   :  { %2681 = vmatprep.subr.bf16.mxu1 %v3135_v0 }
 0x72d   :  { %2682 = vmatpush3.bf16.msra.mxu1 %v2938_v13 }
 0x72e   :  { %2683 = vmatprep.subr.bf16.mxu1 %v3135_v0 }
 0x731   :  { %2684 = vmatpush3.bf16.msra.mxu1 %v2939_v1 }
 0x732   :  { %2685 = vmatprep.subr.bf16.mxu1 %v3135_v0 }
 0x735   :  { %2686 = vmatpush3.bf16.msra.mxu1 %v2940_v24 }
 0x736   :  { %2687 = vmatprep.subr.bf16.mxu1 %v3135_v0 }
 0x739   :  { %2688 = vmatpush3.bf16.msra.mxu1 %v2941_v25 }
 0x73a   :  { %2689 = vmatprep.subr.bf16.mxu1 %v3135_v0 }
 0x73d   :  { %2690 = vmatpush3.bf16.msra.mxu1 %v2942_v3 }
 0x73e   :  { %2691 = vmatprep.subr.bf16.mxu1 %v3135_v0 }
 0x741   :  { %2692 = vmatpush3.bf16.msra.mxu1 %v2943_v26 }
 0x742   :  { %2693 = vmatprep.subr.bf16.mxu1 %v3135_v0 }
 0x745   :  { %2694 = vmatpush3.bf16.msra.mxu1 %v2944_v29 }
 0x746   :  { %2699 = vmatprep.subr.bf16.mxu1 %v3135_v0 }
 0x7fb   :  { %v1902_v31 = vpop.f32.mrb[10].mxu1 }
 0x7fc   :  { %v1906_v49 = vmul.f32 %v1902_v31, %v3442_v38  ;;  %v1914_v27 = vmul.f32 %v1912_v8, %v1902_v31  ;;  %v2678_v28 = vpop.f32.mrb[11].mxu1  ;;  %v2962_v38 = vld [vmem:[#allocation8 + $0xc8] sm:$0xff]  }
 0x7fe   :  { %v1908_v50 = vrot.slane %v1906_v49, 2  ;;  %v1916_v4 = vrot.slane %v1914_v27, 2 }
 0x800   :  { %v1918_v46 = vadd.f32 %v1916_v4, %v1914_v27  ;;  %v1910_v51 = vadd.f32 %v1908_v50, %v1906_v49 }
 0x802   :  { %v1920_v52 = vrot.slane %v1918_v46, 4 }
 0x804   :  { %v1922_v54 = vadd.f32 %v1920_v52, %v1910_v51 }
 0x806   :  { %v1923_v55 = vmul.f32 0.5, %v1922_v54 }
 0x808   :  { %v1924_v44 = vpack.c.bf16 %v1923_v55, %v1923_v55 }
 0x80a   :  { %2696 = vmatmul.mubr.bf16.vlgmr.msra.gmra.mrb[16].mxu1 %v1924_v44 }
 0x80b   :  { %2707 = vmatprep.mubr.msk.bf16.mxu1 %vm3138_vm3, %v3135_v0  ;;  %2700 = vmatpush3.bf16.msra.mxu1 %v2961_v58 }
 0x80c   :  { %2701 = vmatprep.subr.bf16.mxu1 %v3135_v0 }
 0x80f   :  { %2702 = vmatpush3.bf16.msra.mxu1 %v2962_v38 }
 0x810   :  { %2703 = vmatprep.subr.bf16.mxu1 %v3135_v0 }
 0x813   :  { %2704 = vmatpush3.bf16.msra.mxu1 %v2963_v14 }
 0x814   :  { %2705 = vmatprep.subr.bf16.mxu1 %v3135_v0 }
 0x817   :  { %2706 = vmatpush3.bf16.msra.mxu1 %v2964_v15 }
 0x8dd   :  { %v2028_v42 = vpop.f32.mrb[16].mxu1 }
 0x8de   :  { %v2029_v6 = vadd.f32 %v2372_v5, %v2028_v42  ;;  %v2697_v45 = vpop.f32.mrb[17].mxu1 }
 0x8df   :  { %v2031_v9 = vpop.f32.mrb[18].mxu1 }
 0x8e0   :  { %v2035_v10 = vpack.c.bf16 %v2029_v6, %v2029_v6  ;;  %v2698_v11 = vpop.f32.mrb[19].mxu1 }
 0x8e2   :  { %2201 = vmatprep.mubr.bf16.mxu0 %v2035_v10 }
 0x8e3   :  { %2202 = vmatmul.mubr.bf16.vlgmr.msra.gmra.mrb[24].mxu0 %v2034_v12 }
 0x9b6   :  { %v2575_v16 = vpop.f32.mrb[24].mxu0 }
 0x9b7   :  { %v2576_v18 = vpop.f32.mrb[25].mxu0 }
 0x9b8   :  { %v2577_v19 = vadd.f32 %v2576_v18, %v2575_v16  ;;  %v2578_v20 = vpop.f32.mrb[26].mxu0 }
 0x9b9   :  { %v2579_v21 = vpop.f32.mrb[27].mxu0 }
 0x9ba   :  { %v2204_v22 = vadd.f32 %v2577_v19, %v2381_v17 }
 0x9bc   :  { %v2209_v23 = vmax.f32 %v2204_v22, 0.0 }
 0x9be   :  { %v2210_v2 = vpack.c.bf16 %v2209_v23, %v2209_v23 }
 0x9c0   :  { %2708 = vmatmul.mubr.msk.bf16.vlgmr.msra.gmra.mrb[20].mxu1 %vm174_vm2, %v2210_v2 }
 0x9c1   :  { %3080 = shalt.err (!%p3077_p8)
}
 0x9c2   :  { %s3081_s15 = scalar_lea.hbm %s3517_s8, 32 }
 0x9c3   :  { %p3082_p9 = scmp.ne.s32.totalorder %s3517_s8, %s3081_s15  ;;  %p3085_p10 = scmp.lt.u32.totalorder %s3081_s15, %s3517_s8 }
 0x9c5   :  { %p3087_p11 = pnand %p3085_p10, %p3082_p9 }
 0x9c7   :  { %3090 = shalt.err (!%p3087_p11)
}
 0x9c8   :  { %2312 = dma.vmem_to_hbm [thread:$0]  %s2310_s11, 32, %s3517_s8, [#allocation12]   ;;  %v2398_v0 = vld [vmem:[%s3515_s6 + $0x28] ss:$0 sm:$0xff] }
 0x9c9   :  { %s3143_s20 = smov [#allocation10]  }
 0x9ca   :  { %s2299_s0 = sshll.u32 %s3143_s20, 4  ;;  %s2300_s0 = int_to_ptr.vmem [resolvable:$true] %s2299_s0 }
 0x9cb   :  { %s3091_s22 = scalar_lea.vmem %s2300_s0, 32  ;;  %p3096_p13 = scmp.lt.s32.totalorder %s2300_s0, %s2300_s0 }
 0x9cc   :  { %p3092_p12 = scmp.ne.s32.totalorder %s2300_s0, %s3091_s22  ;;  %p3097_p0 = scmp.lt.s32.totalorder %s3091_s22, %s3091_s22 }
 0x9ce   :  { %p3098_p1 = por %p3097_p0, %p3096_p13 }
 0x9d0   :  { %p3099_p2 = pnand %p3098_p1, %p3092_p12 }
 0xa93   :  { %v2285_v13 = vpop.f32.mrb[20].mxu1 }
 0xa94   :  { %v2286_v1 = vadd.f32 %v2398_v0, %v2285_v13  ;;  %v2709_v24 = vpop.f32.mrb[21].mxu1 }
 0xa95   :  { %v2288_v25 = vpop.f32.mrb[22].mxu1 }
 0xa96   :  { %v2291_v3 = vadd.f32 %v2286_v1, %v1415_v7  ;;  %v2710_v26 = vpop.f32.mrb[23].mxu1 }
 0xa98   :  { %2292 = vst [vmem:[#allocation10] sm:$0x3] %v2291_v3 }
 0xa99   :  { %3102 = shalt.err (!%p3099_p2)
}
 0xa9a   :  { %s3103_s6 = scalar_lea.hbm %s3516_s7, 32 }
 0xa9b   :  { %p3104_p3 = scmp.ne.s32.totalorder %s3516_s7, %s3103_s6  ;;  %p3107_p4 = scmp.lt.u32.totalorder %s3103_s6, %s3516_s7 }
 0xa9d   :  { %p3109_p5 = pnand %p3107_p4, %p3104_p3 }
 0xa9f   :  { %3112 = shalt.err (!%p3109_p5)
}
 0xaa0   :  { %2302 = dma.vmem_to_hbm [thread:$0]  %s2300_s0, 32, %s3516_s7, [#allocation4]  }
 0xaa1   :  { %3119 = dma.done.wait [#allocation4], 32  }
 0xaa2   :  { %3120 = vsyncadd [#allocation4], 4294967264 }
 0xaa3   :  { %3121 = dma.done.wait [#allocation12], 32  }
 0xaa4   :  { %3122 = vsyncadd [#allocation12], 4294967264 }
 0xaa5   :  { %2319 = vsyncpa [#allocation3], 1 }
 0xaa6   :  { %2320 = vsyncpa [#allocation6], 1 }
 0xaa7   :  { %2321 = vsyncpa [#allocation9], 1 }
 0xaa8   :  { %2322 = vsyncpa [#allocation4], 1 }
 0xaa9   :  { %2323 = vsyncpa [#allocation12], 1 }

</bundles_post_ra>
